<compile_context>
chip_gen: v7x
topology: tpu7x:2x2x1
jax: 0.10.0
libtpu: 0.0.40
codegen_flags: <defaults>
</compile_context>

<pallas_src>
import jax
import jax.numpy as jnp
from jax import lax
from jax.experimental import pallas as pl
from jax.experimental.pallas import tpu as pltpu

INPUT_DIM = 51
HIDDEN_DIM = 64
NUM_LAYERS = 2
NUM_CLASSES = 2


def _lstm_fc_kernel(x_ref, w1x_ref, w1h_ref, w2x_ref, w2h_ref, b2_ref,
                    wfc_ref, bfc_ref, out_ref):
    T = x_ref.shape[0]
    TB = x_ref.shape[1]
    H = w1h_ref.shape[0]          # hidden dim
    G = w1h_ref.shape[1]          # 4 * H

    w1x = w1x_ref[...]            # (Dp, 4H) -- layer-1 combined bias in row D
    w1h = w1h_ref[...]            # (H, 4H)
    w2x = w2x_ref[...]            # (H, 4H)
    w2h = w2h_ref[...]            # (H, 4H)
    # Hoisted: one explicit broadcast of the layer-2 bias (adding a (1, 4H)
    # row inside the loop would re-broadcast every iteration).
    b2 = jnp.broadcast_to(b2_ref[...], (TB, G))

    # Per-lane constants that turn a single tanh over the whole (TB, 4H) gates
    # tensor into the 4 gate nonlinearities (PyTorch gate order i, f, g, o):
    #   sigmoid(x) = 0.5 * tanh(0.5 * x) + 0.5   (i, f, o lanes)
    #   tanh(x)    = 1.0 * tanh(1.0 * x) + 0.0   (g lanes)
    lane = lax.broadcasted_iota(jnp.int32, (TB, G), 1)
    is_g = (lane >= 2 * H) & (lane < 3 * H)
    sc = jnp.where(is_g, 1.0, 0.5).astype(jnp.float32)
    off = jnp.where(is_g, 0.0, 0.5).astype(jnp.float32)

    def act_update(gates, c):
        a = sc * jnp.tanh(gates * sc) + off        # all 4 gates, 2 full vregs
        i = a[:, 0:H]
        f = a[:, H:2 * H]
        g = a[:, 2 * H:3 * H]
        o = a[:, 3 * H:4 * H]
        c_new = f * c + i * g
        h_new = o * jnp.tanh(c_new)
        return h_new, c_new

    def step(t, carry):
        h1, c1, h2, c2 = carry
        # Off-critical-chain projections: neither depends on this step's h1,
        # so the scheduler can overlap them with earlier work.
        gx1 = jnp.dot(x_ref[t], w1x, preferred_element_type=jnp.float32)
        gh2 = jnp.dot(h2, w2h, preferred_element_type=jnp.float32)
        # Layer 1 (recurrent K=64 matmul on the chain; bias already in gx1).
        g1 = gx1 + jnp.dot(h1, w1h, preferred_element_type=jnp.float32)
        h1, c1 = act_update(g1, c1)
        # Layer 2.
        g2 = jnp.dot(h1, w2x, preferred_element_type=jnp.float32) + gh2 + b2
        h2, c2 = act_update(g2, c2)
        return h1, c1, h2, c2

    zeros = jnp.zeros((TB, H), jnp.float32)
    _, _, h2, _ = lax.fori_loop(0, T, step, (zeros, zeros, zeros, zeros),
                                unroll=True)

    # fc(hn[-1])
    out_ref[...] = (jnp.dot(h2, wfc_ref[...], preferred_element_type=jnp.float32)
                    + bfc_ref[...])


def lstm_model_forward(x, params, *, batch_tile=None):
    """x: (B, T, D) batch_first, like the PyTorch module. Returns (B, num_classes)."""
    B, T, D = x.shape
    (wih1, whh1, bih1, bhh1, wih2, whh2, bih2, bhh2, wfc, bfc) = params
    H = whh1.shape[1]
    G = 4 * H
    C = wfc.shape[0]

    # Padded per-step feature width: x lanes [0, D), bias "1.0" lane at D.
    Dp = -(-max(D + 1, H) // 8) * 8          # = 64 for D=51, H=64
    assert D < Dp

    # Pack x time-major, padded, with the bias lane set to 1.0.
    xt = jnp.transpose(x.astype(jnp.float32), (1, 0, 2))          # (T, B, D)
    x_pad = jnp.zeros((T, B, Dp), jnp.float32)
    x_pad = x_pad.at[:, :, :D].set(xt)
    x_pad = x_pad.at[:, :, D].set(1.0)

    # Layer 1: input projection [W_ih; bias row; 0-pad] -> (Dp, 4H),
    # recurrent projection W_hh -> (H, 4H).
    w1x = jnp.zeros((Dp, G), jnp.float32)
    w1x = w1x.at[:D, :].set(wih1.T.astype(jnp.float32))
    w1x = w1x.at[D, :].set((bih1 + bhh1).astype(jnp.float32))
    w1h = whh1.T.astype(jnp.float32)                              # (H, 4H)

    # Layer 2: separate input / recurrent projections, explicit combined bias.
    w2x = wih2.T.astype(jnp.float32)                              # (H, 4H)
    w2h = whh2.T.astype(jnp.float32)                              # (H, 4H)
    b2 = (bih2 + bhh2).reshape(1, G).astype(jnp.float32)

    wfc_t = wfc.T.astype(jnp.float32)                # (H, C)
    bfc_r = bfc.reshape(1, C).astype(jnp.float32)    # (1, C)

    # Batch grid: split into 2 tiles when big enough (uses both v7x TensorCores).
    if batch_tile is None:
        TB = B // 2 if (B >= 16 and B % 16 == 0) else B
    else:
        TB = batch_tile
    assert B % TB == 0
    grid = (B // TB,)

    return pl.pallas_call(
        _lstm_fc_kernel,
        out_shape=jax.ShapeDtypeStruct((B, C), jnp.float32),
        grid=grid,
        in_specs=[
            pl.BlockSpec((T, TB, Dp), lambda b: (0, b, 0)),      # x (batch-tiled)
            pl.BlockSpec((Dp, G), lambda b: (0, 0)),             # W1 input (+bias row)
            pl.BlockSpec((H, G), lambda b: (0, 0)),              # W1 recurrent
            pl.BlockSpec((H, G), lambda b: (0, 0)),              # W2 input
            pl.BlockSpec((H, G), lambda b: (0, 0)),              # W2 recurrent
            pl.BlockSpec((1, G), lambda b: (0, 0)),              # b2
            pl.BlockSpec((H, C), lambda b: (0, 0)),              # W_fc
            pl.BlockSpec((1, C), lambda b: (0, 0)),              # b_fc
        ],
        out_specs=pl.BlockSpec((TB, C), lambda b: (b, 0)),
        compiler_params=pltpu.CompilerParams(
            dimension_semantics=("parallel",),
            vmem_limit_bytes=64 * 1024 * 1024,
        ),
    )(x_pad, w1x, w1h, w2x, w2h, b2, wfc_t, bfc_r)


def init_params(key, input_dim=INPUT_DIM, hidden_dim=HIDDEN_DIM,
                num_classes=NUM_CLASSES):
    """PyTorch-style uniform(-1/sqrt(H), 1/sqrt(H)) init, deterministic."""
    k = 1.0 / float(jnp.sqrt(jnp.float32(hidden_dim)))
    keys = jax.random.split(key, 10)

    def u(kk, shape):
        return jax.random.uniform(kk, shape, jnp.float32, -k, k)

    wih1 = u(keys[0], (4 * hidden_dim, input_dim))
    whh1 = u(keys[1], (4 * hidden_dim, hidden_dim))
    bih1 = u(keys[2], (4 * hidden_dim,))
    bhh1 = u(keys[3], (4 * hidden_dim,))
    wih2 = u(keys[4], (4 * hidden_dim, hidden_dim))
    whh2 = u(keys[5], (4 * hidden_dim, hidden_dim))
    bih2 = u(keys[6], (4 * hidden_dim,))
    bhh2 = u(keys[7], (4 * hidden_dim,))
    wfc = u(keys[8], (num_classes, hidden_dim))
    bfc = u(keys[9], (num_classes,))
    return (wih1, whh1, bih1, bhh1, wih2, whh2, bih2, bhh2, wfc, bfc)


def reference_forward(x, params):
    """Pure-JAX reference mirroring nn.LSTM(batch_first) + Linear."""
    (wih1, whh1, bih1, bhh1, wih2, whh2, bih2, bhh2, wfc, bfc) = params
    B, T, D = x.shape
    H = whh1.shape[1]

    def cell(x_t, h, c, wih, whh, bih, bhh):
        gates = x_t @ wih.T + h @ whh.T + bih + bhh
        i = jax.nn.sigmoid(gates[:, 0:H])
        f = jax.nn.sigmoid(gates[:, H:2 * H])
        g = jnp.tanh(gates[:, 2 * H:3 * H])
        o = jax.nn.sigmoid(gates[:, 3 * H:4 * H])
        c_new = f * c + i * g
        return o * jnp.tanh(c_new), c_new

    h1 = c1 = h2 = c2 = jnp.zeros((B, H), jnp.float32)
    for t in range(T):
        h1, c1 = cell(x[:, t, :], h1, c1, wih1, whh1, bih1, bhh1)
        h2, c2 = cell(h1, h2, c2, wih2, whh2, bih2, bhh2)
    return h2 @ wfc.T + bfc


if __name__ == "__main__":
    key = jax.random.PRNGKey(0)
    kx, kp = jax.random.split(key)

    B, T = 2, 8
    x = jax.random.normal(kx, (B, T, INPUT_DIM), jnp.float32)
    params = init_params(kp)

    out = lstm_model_forward(x, params)
    out = jax.block_until_ready(out)

    ref = reference_forward(x, params)
    assert out.shape == (B, NUM_CLASSES), out.shape
    assert jnp.allclose(out, ref, atol=2e-4, rtol=2e-4), (out, ref)

    print("KERNEL_OK")
</pallas_src>

<mosaic_0001>
module attributes {stable_mosaic.version = 11 : i64} {
  func.func @_lstm_fc_kernel(%arg0: i32, %arg1: memref<8x2x64xf32, #tpu.memory_space<vmem>>, %arg2: memref<64x256xf32, #tpu.memory_space<vmem>>, %arg3: memref<64x256xf32, #tpu.memory_space<vmem>>, %arg4: memref<64x256xf32, #tpu.memory_space<vmem>>, %arg5: memref<64x256xf32, #tpu.memory_space<vmem>>, %arg6: memref<1x256xf32, #tpu.memory_space<vmem>>, %arg7: memref<64x2xf32, #tpu.memory_space<vmem>>, %arg8: memref<1x2xf32, #tpu.memory_space<vmem>>, %arg9: memref<2x2xf32, #tpu.memory_space<vmem>>) attributes {dimension_semantics = [#tpu.dimension_semantics<parallel>], iteration_bounds = array<i64: 1>, scalar_prefetch = 0 : i64, scratch_operands = 0 : i64, tpu.core_type = #tpu.core_type<tc>, window_params = [{transform_indices = @transform_0, window_bounds = array<i64: 8, 2, 64>}, {pipeline_mode = #tpu.pipeline_mode<synchronous>, transform_indices = @transform_1, window_bounds = array<i64: 64, 256>}, {pipeline_mode = #tpu.pipeline_mode<synchronous>, transform_indices = @transform_2, window_bounds = array<i64: 64, 256>}, {pipeline_mode = #tpu.pipeline_mode<synchronous>, transform_indices = @transform_3, window_bounds = array<i64: 64, 256>}, {pipeline_mode = #tpu.pipeline_mode<synchronous>, transform_indices = @transform_4, window_bounds = array<i64: 64, 256>}, {pipeline_mode = #tpu.pipeline_mode<synchronous>, transform_indices = @transform_5, window_bounds = array<i64: 1, 256>}, {pipeline_mode = #tpu.pipeline_mode<synchronous>, transform_indices = @transform_6, window_bounds = array<i64: 64, 2>}, {pipeline_mode = #tpu.pipeline_mode<synchronous>, transform_indices = @transform_7, window_bounds = array<i64: 1, 2>}, {transform_indices = @transform_8, window_bounds = array<i64: 2, 2>}]} {
    %c0 = arith.constant 0 : index
    %c0_0 = arith.constant 0 : index
    %0 = vector.load %arg2[%c0, %c0_0] : memref<64x256xf32, #tpu.memory_space<vmem>>, vector<64x256xf32>
    %c0_1 = arith.constant 0 : index
    %c0_2 = arith.constant 0 : index
    %1 = vector.load %arg3[%c0_1, %c0_2] : memref<64x256xf32, #tpu.memory_space<vmem>>, vector<64x256xf32>
    %c0_3 = arith.constant 0 : index
    %c0_4 = arith.constant 0 : index
    %2 = vector.load %arg4[%c0_3, %c0_4] : memref<64x256xf32, #tpu.memory_space<vmem>>, vector<64x256xf32>
    %c0_5 = arith.constant 0 : index
    %c0_6 = arith.constant 0 : index
    %3 = vector.load %arg5[%c0_5, %c0_6] : memref<64x256xf32, #tpu.memory_space<vmem>>, vector<64x256xf32>
    %c0_7 = arith.constant 0 : index
    %c0_8 = arith.constant 0 : index
    %4 = vector.load %arg6[%c0_7, %c0_8] : memref<1x256xf32, #tpu.memory_space<vmem>>, vector<1x256xf32>
    %5 = vector.shape_cast %4 : vector<1x256xf32> to vector<1x256xf32>
    %6 = vector.broadcast %5 : vector<1x256xf32> to vector<2x256xf32>
    %7 = tpu.iota {dimensions = array<i32: 1>} : vector<2x256xi32>
    %c128_i32 = arith.constant 128 : i32
    %8 = vector.broadcast %c128_i32 : i32 to vector<2x256xi32>
    %9 = arith.cmpi sge, %7, %8 : vector<2x256xi32>
    %c192_i32 = arith.constant 192 : i32
    %10 = vector.broadcast %c192_i32 : i32 to vector<2x256xi32>
    %11 = arith.cmpi slt, %7, %10 : vector<2x256xi32>
    %12 = arith.andi %9, %11 : vector<2x256xi1>
    %cst = arith.constant 1.000000e+00 : f32
    %cst_9 = arith.constant 5.000000e-01 : f32
    %13 = vector.broadcast %cst : f32 to vector<2x256xf32>
    %14 = vector.broadcast %cst_9 : f32 to vector<2x256xf32>
    %15 = arith.select %12, %13, %14 : vector<2x256xi1>, vector<2x256xf32>
    %cst_10 = arith.constant 0.000000e+00 : f32
    %cst_11 = arith.constant 5.000000e-01 : f32
    %16 = vector.broadcast %cst_10 : f32 to vector<2x256xf32>
    %17 = vector.broadcast %cst_11 : f32 to vector<2x256xf32>
    %18 = arith.select %12, %16, %17 : vector<2x256xi1>, vector<2x256xf32>
    %cst_12 = arith.constant 0.000000e+00 : f32
    %19 = vector.broadcast %cst_12 : f32 to vector<2x64xf32>
    %c0_i32 = arith.constant 0 : i32
    %20 = arith.index_cast %c0_i32 : i32 to index
    %c0_13 = arith.constant 0 : index
    %c0_14 = arith.constant 0 : index
    %21 = vector.load %arg1[%20, %c0_13, %c0_14] : memref<8x2x64xf32, #tpu.memory_space<vmem>>, vector<1x2x64xf32>
    %22 = vector.shape_cast %21 : vector<1x2x64xf32> to vector<2x64xf32>
    %cst_15 = arith.constant dense<0.000000e+00> : vector<2x256xf32>
    %23 = tpu.matmul %22, %0, %cst_15 {dimension_numbers = #tpu.dot_dimension_numbers<[1], [0], [0], [1], [0, 0, 1, 1], [], []>} : vector<2x64xf32>, vector<64x256xf32>, vector<2x256xf32> -> vector<2x256xf32>
    %cst_16 = arith.constant dense<0.000000e+00> : vector<2x256xf32>
    %24 = tpu.matmul %19, %3, %cst_16 {dimension_numbers = #tpu.dot_dimension_numbers<[1], [0], [0], [1], [0, 0, 1, 1], [], []>} : vector<2x64xf32>, vector<64x256xf32>, vector<2x256xf32> -> vector<2x256xf32>
    %cst_17 = arith.constant dense<0.000000e+00> : vector<2x256xf32>
    %25 = tpu.matmul %19, %1, %cst_17 {dimension_numbers = #tpu.dot_dimension_numbers<[1], [0], [0], [1], [0, 0, 1, 1], [], []>} : vector<2x64xf32>, vector<64x256xf32>, vector<2x256xf32> -> vector<2x256xf32>
    %26 = arith.addf %23, %25 : vector<2x256xf32>
    %27 = arith.mulf %26, %15 : vector<2x256xf32>
    %28 = math.tanh %27 : vector<2x256xf32>
    %29 = arith.mulf %15, %28 : vector<2x256xf32>
    %30 = arith.addf %29, %18 : vector<2x256xf32>
    %31 = vector.extract_strided_slice %30 {offsets = [0, 0], sizes = [2, 64], strides = [1, 1]} : vector<2x256xf32> to vector<2x64xf32>
    %32 = vector.extract_strided_slice %30 {offsets = [0, 64], sizes = [2, 64], strides = [1, 1]} : vector<2x256xf32> to vector<2x64xf32>
    %33 = vector.extract_strided_slice %30 {offsets = [0, 128], sizes = [2, 64], strides = [1, 1]} : vector<2x256xf32> to vector<2x64xf32>
    %34 = vector.extract_strided_slice %30 {offsets = [0, 192], sizes = [2, 64], strides = [1, 1]} : vector<2x256xf32> to vector<2x64xf32>
    %35 = arith.mulf %32, %19 : vector<2x64xf32>
    %36 = arith.mulf %31, %33 : vector<2x64xf32>
    %37 = arith.addf %35, %36 : vector<2x64xf32>
    %38 = math.tanh %37 : vector<2x64xf32>
    %39 = arith.mulf %34, %38 : vector<2x64xf32>
    %cst_18 = arith.constant dense<0.000000e+00> : vector<2x256xf32>
    %40 = tpu.matmul %39, %2, %cst_18 {dimension_numbers = #tpu.dot_dimension_numbers<[1], [0], [0], [1], [0, 0, 1, 1], [], []>} : vector<2x64xf32>, vector<64x256xf32>, vector<2x256xf32> -> vector<2x256xf32>
    %41 = arith.addf %40, %24 : vector<2x256xf32>
    %42 = arith.addf %41, %6 : vector<2x256xf32>
    %43 = arith.mulf %42, %15 : vector<2x256xf32>
    %44 = math.tanh %43 : vector<2x256xf32>
    %45 = arith.mulf %15, %44 : vector<2x256xf32>
    %46 = arith.addf %45, %18 : vector<2x256xf32>
    %47 = vector.extract_strided_slice %46 {offsets = [0, 0], sizes = [2, 64], strides = [1, 1]} : vector<2x256xf32> to vector<2x64xf32>
    %48 = vector.extract_strided_slice %46 {offsets = [0, 64], sizes = [2, 64], strides = [1, 1]} : vector<2x256xf32> to vector<2x64xf32>
    %49 = vector.extract_strided_slice %46 {offsets = [0, 128], sizes = [2, 64], strides = [1, 1]} : vector<2x256xf32> to vector<2x64xf32>
    %50 = vector.extract_strided_slice %46 {offsets = [0, 192], sizes = [2, 64], strides = [1, 1]} : vector<2x256xf32> to vector<2x64xf32>
    %51 = arith.mulf %48, %19 : vector<2x64xf32>
    %52 = arith.mulf %47, %49 : vector<2x64xf32>
    %53 = arith.addf %51, %52 : vector<2x64xf32>
    %54 = math.tanh %53 : vector<2x64xf32>
    %55 = arith.mulf %50, %54 : vector<2x64xf32>
    %c1_i32 = arith.constant 1 : i32
    %56 = arith.index_cast %c1_i32 : i32 to index
    %c0_19 = arith.constant 0 : index
    %c0_20 = arith.constant 0 : index
    %57 = vector.load %arg1[%56, %c0_19, %c0_20] : memref<8x2x64xf32, #tpu.memory_space<vmem>>, vector<1x2x64xf32>
    %58 = vector.shape_cast %57 : vector<1x2x64xf32> to vector<2x64xf32>
    %cst_21 = arith.constant dense<0.000000e+00> : vector<2x256xf32>
    %59 = tpu.matmul %58, %0, %cst_21 {dimension_numbers = #tpu.dot_dimension_numbers<[1], [0], [0], [1], [0, 0, 1, 1], [], []>} : vector<2x64xf32>, vector<64x256xf32>, vector<2x256xf32> -> vector<2x256xf32>
    %cst_22 = arith.constant dense<0.000000e+00> : vector<2x256xf32>
    %60 = tpu.matmul %55, %3, %cst_22 {dimension_numbers = #tpu.dot_dimension_numbers<[1], [0], [0], [1], [0, 0, 1, 1], [], []>} : vector<2x64xf32>, vector<64x256xf32>, vector<2x256xf32> -> vector<2x256xf32>
    %cst_23 = arith.constant dense<0.000000e+00> : vector<2x256xf32>
    %61 = tpu.matmul %39, %1, %cst_23 {dimension_numbers = #tpu.dot_dimension_numbers<[1], [0], [0], [1], [0, 0, 1, 1], [], []>} : vector<2x64xf32>, vector<64x256xf32>, vector<2x256xf32> -> vector<2x256xf32>
    %62 = arith.addf %59, %61 : vector<2x256xf32>
    %63 = arith.mulf %62, %15 : vector<2x256xf32>
    %64 = math.tanh %63 : vector<2x256xf32>
    %65 = arith.mulf %15, %64 : vector<2x256xf32>
    %66 = arith.addf %65, %18 : vector<2x256xf32>
    %67 = vector.extract_strided_slice %66 {offsets = [0, 0], sizes = [2, 64], strides = [1, 1]} : vector<2x256xf32> to vector<2x64xf32>
    %68 = vector.extract_strided_slice %66 {offsets = [0, 64], sizes = [2, 64], strides = [1, 1]} : vector<2x256xf32> to vector<2x64xf32>
    %69 = vector.extract_strided_slice %66 {offsets = [0, 128], sizes = [2, 64], strides = [1, 1]} : vector<2x256xf32> to vector<2x64xf32>
    %70 = vector.extract_strided_slice %66 {offsets = [0, 192], sizes = [2, 64], strides = [1, 1]} : vector<2x256xf32> to vector<2x64xf32>
    %71 = arith.mulf %68, %37 : vector<2x64xf32>
    %72 = arith.mulf %67, %69 : vector<2x64xf32>
    %73 = arith.addf %71, %72 : vector<2x64xf32>
    %74 = math.tanh %73 : vector<2x64xf32>
    %75 = arith.mulf %70, %74 : vector<2x64xf32>
    %cst_24 = arith.constant dense<0.000000e+00> : vector<2x256xf32>
    %76 = tpu.matmul %75, %2, %cst_24 {dimension_numbers = #tpu.dot_dimension_numbers<[1], [0], [0], [1], [0, 0, 1, 1], [], []>} : vector<2x64xf32>, vector<64x256xf32>, vector<2x256xf32> -> vector<2x256xf32>
    %77 = arith.addf %76, %60 : vector<2x256xf32>
    %78 = arith.addf %77, %6 : vector<2x256xf32>
    %79 = arith.mulf %78, %15 : vector<2x256xf32>
    %80 = math.tanh %79 : vector<2x256xf32>
    %81 = arith.mulf %15, %80 : vector<2x256xf32>
    %82 = arith.addf %81, %18 : vector<2x256xf32>
    %83 = vector.extract_strided_slice %82 {offsets = [0, 0], sizes = [2, 64], strides = [1, 1]} : vector<2x256xf32> to vector<2x64xf32>
    %84 = vector.extract_strided_slice %82 {offsets = [0, 64], sizes = [2, 64], strides = [1, 1]} : vector<2x256xf32> to vector<2x64xf32>
    %85 = vector.extract_strided_slice %82 {offsets = [0, 128], sizes = [2, 64], strides = [1, 1]} : vector<2x256xf32> to vector<2x64xf32>
    %86 = vector.extract_strided_slice %82 {offsets = [0, 192], sizes = [2, 64], strides = [1, 1]} : vector<2x256xf32> to vector<2x64xf32>
    %87 = arith.mulf %84, %53 : vector<2x64xf32>
    %88 = arith.mulf %83, %85 : vector<2x64xf32>
    %89 = arith.addf %87, %88 : vector<2x64xf32>
    %90 = math.tanh %89 : vector<2x64xf32>
    %91 = arith.mulf %86, %90 : vector<2x64xf32>
    %c2_i32 = arith.constant 2 : i32
    %92 = arith.index_cast %c2_i32 : i32 to index
    %c0_25 = arith.constant 0 : index
    %c0_26 = arith.constant 0 : index
    %93 = vector.load %arg1[%92, %c0_25, %c0_26] : memref<8x2x64xf32, #tpu.memory_space<vmem>>, vector<1x2x64xf32>
    %94 = vector.shape_cast %93 : vector<1x2x64xf32> to vector<2x64xf32>
    %cst_27 = arith.constant dense<0.000000e+00> : vector<2x256xf32>
    %95 = tpu.matmul %94, %0, %cst_27 {dimension_numbers = #tpu.dot_dimension_numbers<[1], [0], [0], [1], [0, 0, 1, 1], [], []>} : vector<2x64xf32>, vector<64x256xf32>, vector<2x256xf32> -> vector<2x256xf32>
    %cst_28 = arith.constant dense<0.000000e+00> : vector<2x256xf32>
    %96 = tpu.matmul %91, %3, %cst_28 {dimension_numbers = #tpu.dot_dimension_numbers<[1], [0], [0], [1], [0, 0, 1, 1], [], []>} : vector<2x64xf32>, vector<64x256xf32>, vector<2x256xf32> -> vector<2x256xf32>
    %cst_29 = arith.constant dense<0.000000e+00> : vector<2x256xf32>
    %97 = tpu.matmul %75, %1, %cst_29 {dimension_numbers = #tpu.dot_dimension_numbers<[1], [0], [0], [1], [0, 0, 1, 1], [], []>} : vector<2x64xf32>, vector<64x256xf32>, vector<2x256xf32> -> vector<2x256xf32>
    %98 = arith.addf %95, %97 : vector<2x256xf32>
    %99 = arith.mulf %98, %15 : vector<2x256xf32>
    %100 = math.tanh %99 : vector<2x256xf32>
    %101 = arith.mulf %15, %100 : vector<2x256xf32>
    %102 = arith.addf %101, %18 : vector<2x256xf32>
    %103 = vector.extract_strided_slice %102 {offsets = [0, 0], sizes = [2, 64], strides = [1, 1]} : vector<2x256xf32> to vector<2x64xf32>
    %104 = vector.extract_strided_slice %102 {offsets = [0, 64], sizes = [2, 64], strides = [1, 1]} : vector<2x256xf32> to vector<2x64xf32>
    %105 = vector.extract_strided_slice %102 {offsets = [0, 128], sizes = [2, 64], strides = [1, 1]} : vector<2x256xf32> to vector<2x64xf32>
    %106 = vector.extract_strided_slice %102 {offsets = [0, 192], sizes = [2, 64], strides = [1, 1]} : vector<2x256xf32> to vector<2x64xf32>
    %107 = arith.mulf %104, %73 : vector<2x64xf32>
    %108 = arith.mulf %103, %105 : vector<2x64xf32>
    %109 = arith.addf %107, %108 : vector<2x64xf32>
    %110 = math.tanh %109 : vector<2x64xf32>
    %111 = arith.mulf %106, %110 : vector<2x64xf32>
    %cst_30 = arith.constant dense<0.000000e+00> : vector<2x256xf32>
    %112 = tpu.matmul %111, %2, %cst_30 {dimension_numbers = #tpu.dot_dimension_numbers<[1], [0], [0], [1], [0, 0, 1, 1], [], []>} : vector<2x64xf32>, vector<64x256xf32>, vector<2x256xf32> -> vector<2x256xf32>
    %113 = arith.addf %112, %96 : vector<2x256xf32>
    %114 = arith.addf %113, %6 : vector<2x256xf32>
    %115 = arith.mulf %114, %15 : vector<2x256xf32>
    %116 = math.tanh %115 : vector<2x256xf32>
    %117 = arith.mulf %15, %116 : vector<2x256xf32>
    %118 = arith.addf %117, %18 : vector<2x256xf32>
    %119 = vector.extract_strided_slice %118 {offsets = [0, 0], sizes = [2, 64], strides = [1, 1]} : vector<2x256xf32> to vector<2x64xf32>
    %120 = vector.extract_strided_slice %118 {offsets = [0, 64], sizes = [2, 64], strides = [1, 1]} : vector<2x256xf32> to vector<2x64xf32>
    %121 = vector.extract_strided_slice %118 {offsets = [0, 128], sizes = [2, 64], strides = [1, 1]} : vector<2x256xf32> to vector<2x64xf32>
    %122 = vector.extract_strided_slice %118 {offsets = [0, 192], sizes = [2, 64], strides = [1, 1]} : vector<2x256xf32> to vector<2x64xf32>
    %123 = arith.mulf %120, %89 : vector<2x64xf32>
    %124 = arith.mulf %119, %121 : vector<2x64xf32>
    %125 = arith.addf %123, %124 : vector<2x64xf32>
    %126 = math.tanh %125 : vector<2x64xf32>
    %127 = arith.mulf %122, %126 : vector<2x64xf32>
    %c3_i32 = arith.constant 3 : i32
    %128 = arith.index_cast %c3_i32 : i32 to index
    %c0_31 = arith.constant 0 : index
    %c0_32 = arith.constant 0 : index
    %129 = vector.load %arg1[%128, %c0_31, %c0_32] : memref<8x2x64xf32, #tpu.memory_space<vmem>>, vector<1x2x64xf32>
    %130 = vector.shape_cast %129 : vector<1x2x64xf32> to vector<2x64xf32>
    %cst_33 = arith.constant dense<0.000000e+00> : vector<2x256xf32>
    %131 = tpu.matmul %130, %0, %cst_33 {dimension_numbers = #tpu.dot_dimension_numbers<[1], [0], [0], [1], [0, 0, 1, 1], [], []>} : vector<2x64xf32>, vector<64x256xf32>, vector<2x256xf32> -> vector<2x256xf32>
    %cst_34 = arith.constant dense<0.000000e+00> : vector<2x256xf32>
    %132 = tpu.matmul %127, %3, %cst_34 {dimension_numbers = #tpu.dot_dimension_numbers<[1], [0], [0], [1], [0, 0, 1, 1], [], []>} : vector<2x64xf32>, vector<64x256xf32>, vector<2x256xf32> -> vector<2x256xf32>
    %cst_35 = arith.constant dense<0.000000e+00> : vector<2x256xf32>
    %133 = tpu.matmul %111, %1, %cst_35 {dimension_numbers = #tpu.dot_dimension_numbers<[1], [0], [0], [1], [0, 0, 1, 1], [], []>} : vector<2x64xf32>, vector<64x256xf32>, vector<2x256xf32> -> vector<2x256xf32>
    %134 = arith.addf %131, %133 : vector<2x256xf32>
    %135 = arith.mulf %134, %15 : vector<2x256xf32>
    %136 = math.tanh %135 : vector<2x256xf32>
    %137 = arith.mulf %15, %136 : vector<2x256xf32>
    %138 = arith.addf %137, %18 : vector<2x256xf32>
    %139 = vector.extract_strided_slice %138 {offsets = [0, 0], sizes = [2, 64], strides = [1, 1]} : vector<2x256xf32> to vector<2x64xf32>
    %140 = vector.extract_strided_slice %138 {offsets = [0, 64], sizes = [2, 64], strides = [1, 1]} : vector<2x256xf32> to vector<2x64xf32>
    %141 = vector.extract_strided_slice %138 {offsets = [0, 128], sizes = [2, 64], strides = [1, 1]} : vector<2x256xf32> to vector<2x64xf32>
    %142 = vector.extract_strided_slice %138 {offsets = [0, 192], sizes = [2, 64], strides = [1, 1]} : vector<2x256xf32> to vector<2x64xf32>
    %143 = arith.mulf %140, %109 : vector<2x64xf32>
    %144 = arith.mulf %139, %141 : vector<2x64xf32>
    %145 = arith.addf %143, %144 : vector<2x64xf32>
    %146 = math.tanh %145 : vector<2x64xf32>
    %147 = arith.mulf %142, %146 : vector<2x64xf32>
    %cst_36 = arith.constant dense<0.000000e+00> : vector<2x256xf32>
    %148 = tpu.matmul %147, %2, %cst_36 {dimension_numbers = #tpu.dot_dimension_numbers<[1], [0], [0], [1], [0, 0, 1, 1], [], []>} : vector<2x64xf32>, vector<64x256xf32>, vector<2x256xf32> -> vector<2x256xf32>
    %149 = arith.addf %148, %132 : vector<2x256xf32>
    %150 = arith.addf %149, %6 : vector<2x256xf32>
    %151 = arith.mulf %150, %15 : vector<2x256xf32>
    %152 = math.tanh %151 : vector<2x256xf32>
    %153 = arith.mulf %15, %152 : vector<2x256xf32>
    %154 = arith.addf %153, %18 : vector<2x256xf32>
    %155 = vector.extract_strided_slice %154 {offsets = [0, 0], sizes = [2, 64], strides = [1, 1]} : vector<2x256xf32> to vector<2x64xf32>
    %156 = vector.extract_strided_slice %154 {offsets = [0, 64], sizes = [2, 64], strides = [1, 1]} : vector<2x256xf32> to vector<2x64xf32>
    %157 = vector.extract_strided_slice %154 {offsets = [0, 128], sizes = [2, 64], strides = [1, 1]} : vector<2x256xf32> to vector<2x64xf32>
    %158 = vector.extract_strided_slice %154 {offsets = [0, 192], sizes = [2, 64], strides = [1, 1]} : vector<2x256xf32> to vector<2x64xf32>
    %159 = arith.mulf %156, %125 : vector<2x64xf32>
    %160 = arith.mulf %155, %157 : vector<2x64xf32>
    %161 = arith.addf %159, %160 : vector<2x64xf32>
    %162 = math.tanh %161 : vector<2x64xf32>
    %163 = arith.mulf %158, %162 : vector<2x64xf32>
    %c4_i32 = arith.constant 4 : i32
    %164 = arith.index_cast %c4_i32 : i32 to index
    %c0_37 = arith.constant 0 : index
    %c0_38 = arith.constant 0 : index
    %165 = vector.load %arg1[%164, %c0_37, %c0_38] : memref<8x2x64xf32, #tpu.memory_space<vmem>>, vector<1x2x64xf32>
    %166 = vector.shape_cast %165 : vector<1x2x64xf32> to vector<2x64xf32>
    %cst_39 = arith.constant dense<0.000000e+00> : vector<2x256xf32>
    %167 = tpu.matmul %166, %0, %cst_39 {dimension_numbers = #tpu.dot_dimension_numbers<[1], [0], [0], [1], [0, 0, 1, 1], [], []>} : vector<2x64xf32>, vector<64x256xf32>, vector<2x256xf32> -> vector<2x256xf32>
    %cst_40 = arith.constant dense<0.000000e+00> : vector<2x256xf32>
    %168 = tpu.matmul %163, %3, %cst_40 {dimension_numbers = #tpu.dot_dimension_numbers<[1], [0], [0], [1], [0, 0, 1, 1], [], []>} : vector<2x64xf32>, vector<64x256xf32>, vector<2x256xf32> -> vector<2x256xf32>
    %cst_41 = arith.constant dense<0.000000e+00> : vector<2x256xf32>
    %169 = tpu.matmul %147, %1, %cst_41 {dimension_numbers = #tpu.dot_dimension_numbers<[1], [0], [0], [1], [0, 0, 1, 1], [], []>} : vector<2x64xf32>, vector<64x256xf32>, vector<2x256xf32> -> vector<2x256xf32>
    %170 = arith.addf %167, %169 : vector<2x256xf32>
    %171 = arith.mulf %170, %15 : vector<2x256xf32>
    %172 = math.tanh %171 : vector<2x256xf32>
    %173 = arith.mulf %15, %172 : vector<2x256xf32>
    %174 = arith.addf %173, %18 : vector<2x256xf32>
    %175 = vector.extract_strided_slice %174 {offsets = [0, 0], sizes = [2, 64], strides = [1, 1]} : vector<2x256xf32> to vector<2x64xf32>
    %176 = vector.extract_strided_slice %174 {offsets = [0, 64], sizes = [2, 64], strides = [1, 1]} : vector<2x256xf32> to vector<2x64xf32>
    %177 = vector.extract_strided_slice %174 {offsets = [0, 128], sizes = [2, 64], strides = [1, 1]} : vector<2x256xf32> to vector<2x64xf32>
    %178 = vector.extract_strided_slice %174 {offsets = [0, 192], sizes = [2, 64], strides = [1, 1]} : vector<2x256xf32> to vector<2x64xf32>
    %179 = arith.mulf %176, %145 : vector<2x64xf32>
    %180 = arith.mulf %175, %177 : vector<2x64xf32>
    %181 = arith.addf %179, %180 : vector<2x64xf32>
    %182 = math.tanh %181 : vector<2x64xf32>
    %183 = arith.mulf %178, %182 : vector<2x64xf32>
    %cst_42 = arith.constant dense<0.000000e+00> : vector<2x256xf32>
    %184 = tpu.matmul %183, %2, %cst_42 {dimension_numbers = #tpu.dot_dimension_numbers<[1], [0], [0], [1], [0, 0, 1, 1], [], []>} : vector<2x64xf32>, vector<64x256xf32>, vector<2x256xf32> -> vector<2x256xf32>
    %185 = arith.addf %184, %168 : vector<2x256xf32>
    %186 = arith.addf %185, %6 : vector<2x256xf32>
    %187 = arith.mulf %186, %15 : vector<2x256xf32>
    %188 = math.tanh %187 : vector<2x256xf32>
    %189 = arith.mulf %15, %188 : vector<2x256xf32>
    %190 = arith.addf %189, %18 : vector<2x256xf32>
    %191 = vector.extract_strided_slice %190 {offsets = [0, 0], sizes = [2, 64], strides = [1, 1]} : vector<2x256xf32> to vector<2x64xf32>
    %192 = vector.extract_strided_slice %190 {offsets = [0, 64], sizes = [2, 64], strides = [1, 1]} : vector<2x256xf32> to vector<2x64xf32>
    %193 = vector.extract_strided_slice %190 {offsets = [0, 128], sizes = [2, 64], strides = [1, 1]} : vector<2x256xf32> to vector<2x64xf32>
    %194 = vector.extract_strided_slice %190 {offsets = [0, 192], sizes = [2, 64], strides = [1, 1]} : vector<2x256xf32> to vector<2x64xf32>
    %195 = arith.mulf %192, %161 : vector<2x64xf32>
    %196 = arith.mulf %191, %193 : vector<2x64xf32>
    %197 = arith.addf %195, %196 : vector<2x64xf32>
    %198 = math.tanh %197 : vector<2x64xf32>
    %199 = arith.mulf %194, %198 : vector<2x64xf32>
    %c5_i32 = arith.constant 5 : i32
    %200 = arith.index_cast %c5_i32 : i32 to index
    %c0_43 = arith.constant 0 : index
    %c0_44 = arith.constant 0 : index
    %201 = vector.load %arg1[%200, %c0_43, %c0_44] : memref<8x2x64xf32, #tpu.memory_space<vmem>>, vector<1x2x64xf32>
    %202 = vector.shape_cast %201 : vector<1x2x64xf32> to vector<2x64xf32>
    %cst_45 = arith.constant dense<0.000000e+00> : vector<2x256xf32>
    %203 = tpu.matmul %202, %0, %cst_45 {dimension_numbers = #tpu.dot_dimension_numbers<[1], [0], [0], [1], [0, 0, 1, 1], [], []>} : vector<2x64xf32>, vector<64x256xf32>, vector<2x256xf32> -> vector<2x256xf32>
    %cst_46 = arith.constant dense<0.000000e+00> : vector<2x256xf32>
    %204 = tpu.matmul %199, %3, %cst_46 {dimension_numbers = #tpu.dot_dimension_numbers<[1], [0], [0], [1], [0, 0, 1, 1], [], []>} : vector<2x64xf32>, vector<64x256xf32>, vector<2x256xf32> -> vector<2x256xf32>
    %cst_47 = arith.constant dense<0.000000e+00> : vector<2x256xf32>
    %205 = tpu.matmul %183, %1, %cst_47 {dimension_numbers = #tpu.dot_dimension_numbers<[1], [0], [0], [1], [0, 0, 1, 1], [], []>} : vector<2x64xf32>, vector<64x256xf32>, vector<2x256xf32> -> vector<2x256xf32>
    %206 = arith.addf %203, %205 : vector<2x256xf32>
    %207 = arith.mulf %206, %15 : vector<2x256xf32>
    %208 = math.tanh %207 : vector<2x256xf32>
    %209 = arith.mulf %15, %208 : vector<2x256xf32>
    %210 = arith.addf %209, %18 : vector<2x256xf32>
    %211 = vector.extract_strided_slice %210 {offsets = [0, 0], sizes = [2, 64], strides = [1, 1]} : vector<2x256xf32> to vector<2x64xf32>
    %212 = vector.extract_strided_slice %210 {offsets = [0, 64], sizes = [2, 64], strides = [1, 1]} : vector<2x256xf32> to vector<2x64xf32>
    %213 = vector.extract_strided_slice %210 {offsets = [0, 128], sizes = [2, 64], strides = [1, 1]} : vector<2x256xf32> to vector<2x64xf32>
    %214 = vector.extract_strided_slice %210 {offsets = [0, 192], sizes = [2, 64], strides = [1, 1]} : vector<2x256xf32> to vector<2x64xf32>
    %215 = arith.mulf %212, %181 : vector<2x64xf32>
    %216 = arith.mulf %211, %213 : vector<2x64xf32>
    %217 = arith.addf %215, %216 : vector<2x64xf32>
    %218 = math.tanh %217 : vector<2x64xf32>
    %219 = arith.mulf %214, %218 : vector<2x64xf32>
    %cst_48 = arith.constant dense<0.000000e+00> : vector<2x256xf32>
    %220 = tpu.matmul %219, %2, %cst_48 {dimension_numbers = #tpu.dot_dimension_numbers<[1], [0], [0], [1], [0, 0, 1, 1], [], []>} : vector<2x64xf32>, vector<64x256xf32>, vector<2x256xf32> -> vector<2x256xf32>
    %221 = arith.addf %220, %204 : vector<2x256xf32>
    %222 = arith.addf %221, %6 : vector<2x256xf32>
    %223 = arith.mulf %222, %15 : vector<2x256xf32>
    %224 = math.tanh %223 : vector<2x256xf32>
    %225 = arith.mulf %15, %224 : vector<2x256xf32>
    %226 = arith.addf %225, %18 : vector<2x256xf32>
    %227 = vector.extract_strided_slice %226 {offsets = [0, 0], sizes = [2, 64], strides = [1, 1]} : vector<2x256xf32> to vector<2x64xf32>
    %228 = vector.extract_strided_slice %226 {offsets = [0, 64], sizes = [2, 64], strides = [1, 1]} : vector<2x256xf32> to vector<2x64xf32>
    %229 = vector.extract_strided_slice %226 {offsets = [0, 128], sizes = [2, 64], strides = [1, 1]} : vector<2x256xf32> to vector<2x64xf32>
    %230 = vector.extract_strided_slice %226 {offsets = [0, 192], sizes = [2, 64], strides = [1, 1]} : vector<2x256xf32> to vector<2x64xf32>
    %231 = arith.mulf %228, %197 : vector<2x64xf32>
    %232 = arith.mulf %227, %229 : vector<2x64xf32>
    %233 = arith.addf %231, %232 : vector<2x64xf32>
    %234 = math.tanh %233 : vector<2x64xf32>
    %235 = arith.mulf %230, %234 : vector<2x64xf32>
    %c6_i32 = arith.constant 6 : i32
    %236 = arith.index_cast %c6_i32 : i32 to index
    %c0_49 = arith.constant 0 : index
    %c0_50 = arith.constant 0 : index
    %237 = vector.load %arg1[%236, %c0_49, %c0_50] : memref<8x2x64xf32, #tpu.memory_space<vmem>>, vector<1x2x64xf32>
    %238 = vector.shape_cast %237 : vector<1x2x64xf32> to vector<2x64xf32>
    %cst_51 = arith.constant dense<0.000000e+00> : vector<2x256xf32>
    %239 = tpu.matmul %238, %0, %cst_51 {dimension_numbers = #tpu.dot_dimension_numbers<[1], [0], [0], [1], [0, 0, 1, 1], [], []>} : vector<2x64xf32>, vector<64x256xf32>, vector<2x256xf32> -> vector<2x256xf32>
    %cst_52 = arith.constant dense<0.000000e+00> : vector<2x256xf32>
    %240 = tpu.matmul %235, %3, %cst_52 {dimension_numbers = #tpu.dot_dimension_numbers<[1], [0], [0], [1], [0, 0, 1, 1], [], []>} : vector<2x64xf32>, vector<64x256xf32>, vector<2x256xf32> -> vector<2x256xf32>
    %cst_53 = arith.constant dense<0.000000e+00> : vector<2x256xf32>
    %241 = tpu.matmul %219, %1, %cst_53 {dimension_numbers = #tpu.dot_dimension_numbers<[1], [0], [0], [1], [0, 0, 1, 1], [], []>} : vector<2x64xf32>, vector<64x256xf32>, vector<2x256xf32> -> vector<2x256xf32>
    %242 = arith.addf %239, %241 : vector<2x256xf32>
    %243 = arith.mulf %242, %15 : vector<2x256xf32>
    %244 = math.tanh %243 : vector<2x256xf32>
    %245 = arith.mulf %15, %244 : vector<2x256xf32>
    %246 = arith.addf %245, %18 : vector<2x256xf32>
    %247 = vector.extract_strided_slice %246 {offsets = [0, 0], sizes = [2, 64], strides = [1, 1]} : vector<2x256xf32> to vector<2x64xf32>
    %248 = vector.extract_strided_slice %246 {offsets = [0, 64], sizes = [2, 64], strides = [1, 1]} : vector<2x256xf32> to vector<2x64xf32>
    %249 = vector.extract_strided_slice %246 {offsets = [0, 128], sizes = [2, 64], strides = [1, 1]} : vector<2x256xf32> to vector<2x64xf32>
    %250 = vector.extract_strided_slice %246 {offsets = [0, 192], sizes = [2, 64], strides = [1, 1]} : vector<2x256xf32> to vector<2x64xf32>
    %251 = arith.mulf %248, %217 : vector<2x64xf32>
    %252 = arith.mulf %247, %249 : vector<2x64xf32>
    %253 = arith.addf %251, %252 : vector<2x64xf32>
    %254 = math.tanh %253 : vector<2x64xf32>
    %255 = arith.mulf %250, %254 : vector<2x64xf32>
    %cst_54 = arith.constant dense<0.000000e+00> : vector<2x256xf32>
    %256 = tpu.matmul %255, %2, %cst_54 {dimension_numbers = #tpu.dot_dimension_numbers<[1], [0], [0], [1], [0, 0, 1, 1], [], []>} : vector<2x64xf32>, vector<64x256xf32>, vector<2x256xf32> -> vector<2x256xf32>
    %257 = arith.addf %256, %240 : vector<2x256xf32>
    %258 = arith.addf %257, %6 : vector<2x256xf32>
    %259 = arith.mulf %258, %15 : vector<2x256xf32>
    %260 = math.tanh %259 : vector<2x256xf32>
    %261 = arith.mulf %15, %260 : vector<2x256xf32>
    %262 = arith.addf %261, %18 : vector<2x256xf32>
    %263 = vector.extract_strided_slice %262 {offsets = [0, 0], sizes = [2, 64], strides = [1, 1]} : vector<2x256xf32> to vector<2x64xf32>
    %264 = vector.extract_strided_slice %262 {offsets = [0, 64], sizes = [2, 64], strides = [1, 1]} : vector<2x256xf32> to vector<2x64xf32>
    %265 = vector.extract_strided_slice %262 {offsets = [0, 128], sizes = [2, 64], strides = [1, 1]} : vector<2x256xf32> to vector<2x64xf32>
    %266 = vector.extract_strided_slice %262 {offsets = [0, 192], sizes = [2, 64], strides = [1, 1]} : vector<2x256xf32> to vector<2x64xf32>
    %267 = arith.mulf %264, %233 : vector<2x64xf32>
    %268 = arith.mulf %263, %265 : vector<2x64xf32>
    %269 = arith.addf %267, %268 : vector<2x64xf32>
    %270 = math.tanh %269 : vector<2x64xf32>
    %271 = arith.mulf %266, %270 : vector<2x64xf32>
    %c7_i32 = arith.constant 7 : i32
    %272 = arith.index_cast %c7_i32 : i32 to index
    %c0_55 = arith.constant 0 : index
    %c0_56 = arith.constant 0 : index
    %273 = vector.load %arg1[%272, %c0_55, %c0_56] : memref<8x2x64xf32, #tpu.memory_space<vmem>>, vector<1x2x64xf32>
    %274 = vector.shape_cast %273 : vector<1x2x64xf32> to vector<2x64xf32>
    %cst_57 = arith.constant dense<0.000000e+00> : vector<2x256xf32>
    %275 = tpu.matmul %274, %0, %cst_57 {dimension_numbers = #tpu.dot_dimension_numbers<[1], [0], [0], [1], [0, 0, 1, 1], [], []>} : vector<2x64xf32>, vector<64x256xf32>, vector<2x256xf32> -> vector<2x256xf32>
    %cst_58 = arith.constant dense<0.000000e+00> : vector<2x256xf32>
    %276 = tpu.matmul %271, %3, %cst_58 {dimension_numbers = #tpu.dot_dimension_numbers<[1], [0], [0], [1], [0, 0, 1, 1], [], []>} : vector<2x64xf32>, vector<64x256xf32>, vector<2x256xf32> -> vector<2x256xf32>
    %cst_59 = arith.constant dense<0.000000e+00> : vector<2x256xf32>
    %277 = tpu.matmul %255, %1, %cst_59 {dimension_numbers = #tpu.dot_dimension_numbers<[1], [0], [0], [1], [0, 0, 1, 1], [], []>} : vector<2x64xf32>, vector<64x256xf32>, vector<2x256xf32> -> vector<2x256xf32>
    %278 = arith.addf %275, %277 : vector<2x256xf32>
    %279 = arith.mulf %278, %15 : vector<2x256xf32>
    %280 = math.tanh %279 : vector<2x256xf32>
    %281 = arith.mulf %15, %280 : vector<2x256xf32>
    %282 = arith.addf %281, %18 : vector<2x256xf32>
    %283 = vector.extract_strided_slice %282 {offsets = [0, 0], sizes = [2, 64], strides = [1, 1]} : vector<2x256xf32> to vector<2x64xf32>
    %284 = vector.extract_strided_slice %282 {offsets = [0, 64], sizes = [2, 64], strides = [1, 1]} : vector<2x256xf32> to vector<2x64xf32>
    %285 = vector.extract_strided_slice %282 {offsets = [0, 128], sizes = [2, 64], strides = [1, 1]} : vector<2x256xf32> to vector<2x64xf32>
    %286 = vector.extract_strided_slice %282 {offsets = [0, 192], sizes = [2, 64], strides = [1, 1]} : vector<2x256xf32> to vector<2x64xf32>
    %287 = arith.mulf %284, %253 : vector<2x64xf32>
    %288 = arith.mulf %283, %285 : vector<2x64xf32>
    %289 = arith.addf %287, %288 : vector<2x64xf32>
    %290 = math.tanh %289 : vector<2x64xf32>
    %291 = arith.mulf %286, %290 : vector<2x64xf32>
    %cst_60 = arith.constant dense<0.000000e+00> : vector<2x256xf32>
    %292 = tpu.matmul %291, %2, %cst_60 {dimension_numbers = #tpu.dot_dimension_numbers<[1], [0], [0], [1], [0, 0, 1, 1], [], []>} : vector<2x64xf32>, vector<64x256xf32>, vector<2x256xf32> -> vector<2x256xf32>
    %293 = arith.addf %292, %276 : vector<2x256xf32>
    %294 = arith.addf %293, %6 : vector<2x256xf32>
    %295 = arith.mulf %294, %15 : vector<2x256xf32>
    %296 = math.tanh %295 : vector<2x256xf32>
    %297 = arith.mulf %15, %296 : vector<2x256xf32>
    %298 = arith.addf %297, %18 : vector<2x256xf32>
    %299 = vector.extract_strided_slice %298 {offsets = [0, 0], sizes = [2, 64], strides = [1, 1]} : vector<2x256xf32> to vector<2x64xf32>
    %300 = vector.extract_strided_slice %298 {offsets = [0, 64], sizes = [2, 64], strides = [1, 1]} : vector<2x256xf32> to vector<2x64xf32>
    %301 = vector.extract_strided_slice %298 {offsets = [0, 128], sizes = [2, 64], strides = [1, 1]} : vector<2x256xf32> to vector<2x64xf32>
    %302 = vector.extract_strided_slice %298 {offsets = [0, 192], sizes = [2, 64], strides = [1, 1]} : vector<2x256xf32> to vector<2x64xf32>
    %303 = arith.mulf %300, %269 : vector<2x64xf32>
    %304 = arith.mulf %299, %301 : vector<2x64xf32>
    %305 = arith.addf %303, %304 : vector<2x64xf32>
    %306 = math.tanh %305 : vector<2x64xf32>
    %307 = arith.mulf %302, %306 : vector<2x64xf32>
    %c8_i32 = arith.constant 8 : i32
    %c0_61 = arith.constant 0 : index
    %c0_62 = arith.constant 0 : index
    %308 = vector.load %arg7[%c0_61, %c0_62] : memref<64x2xf32, #tpu.memory_space<vmem>>, vector<64x2xf32>
    %cst_63 = arith.constant dense<0.000000e+00> : vector<2x2xf32>
    %309 = tpu.matmul %307, %308, %cst_63 {dimension_numbers = #tpu.dot_dimension_numbers<[1], [0], [0], [1], [0, 0, 1, 1], [], []>} : vector<2x64xf32>, vector<64x2xf32>, vector<2x2xf32> -> vector<2x2xf32>
    %c0_64 = arith.constant 0 : index
    %c0_65 = arith.constant 0 : index
    %310 = vector.load %arg8[%c0_64, %c0_65] : memref<1x2xf32, #tpu.memory_space<vmem>>, vector<1x2xf32>
    %311 = vector.broadcast %310 : vector<1x2xf32> to vector<2x2xf32>
    %312 = arith.addf %309, %311 : vector<2x2xf32>
    %c0_66 = arith.constant 0 : index
    %c0_67 = arith.constant 0 : index
    %313 = vector.load %arg9[%c0_66, %c0_67] : memref<2x2xf32, #tpu.memory_space<vmem>>, vector<2x2xf32>
    tpu.vector_store %arg9[%c0_66, %c0_67], %312 {strides = array<i32>} : memref<2x2xf32, #tpu.memory_space<vmem>>, vector<2x2xf32>,
    return
  }
  func.func @transform_0(%arg0: i32) -> (i32, i32, i32) {
    %c0_i32 = arith.constant 0 : i32
    %c0_i32_0 = arith.constant 0 : i32
    %c0_i32_1 = arith.constant 0 : i32
    return %c0_i32, %arg0, %c0_i32_0 : i32, i32, i32
  }
  func.func @transform_1(%arg0: i32) -> (i32, i32) {
    %c0_i32 = arith.constant 0 : i32
    %c0_i32_0 = arith.constant 0 : i32
    %c0_i32_1 = arith.constant 0 : i32
    return %c0_i32, %c0_i32_0 : i32, i32
  }
  func.func @transform_2(%arg0: i32) -> (i32, i32) {
    %c0_i32 = arith.constant 0 : i32
    %c0_i32_0 = arith.constant 0 : i32
    %c0_i32_1 = arith.constant 0 : i32
    return %c0_i32, %c0_i32_0 : i32, i32
  }
  func.func @transform_3(%arg0: i32) -> (i32, i32) {
    %c0_i32 = arith.constant 0 : i32
    %c0_i32_0 = arith.constant 0 : i32
    %c0_i32_1 = arith.constant 0 : i32
    return %c0_i32, %c0_i32_0 : i32, i32
  }
  func.func @transform_4(%arg0: i32) -> (i32, i32) {
    %c0_i32 = arith.constant 0 : i32
    %c0_i32_0 = arith.constant 0 : i32
    %c0_i32_1 = arith.constant 0 : i32
    return %c0_i32, %c0_i32_0 : i32, i32
  }
  func.func @transform_5(%arg0: i32) -> (i32, i32) {
    %c0_i32 = arith.constant 0 : i32
    %c0_i32_0 = arith.constant 0 : i32
    %c0_i32_1 = arith.constant 0 : i32
    return %c0_i32, %c0_i32_0 : i32, i32
  }
  func.func @transform_6(%arg0: i32) -> (i32, i32) {
    %c0_i32 = arith.constant 0 : i32
    %c0_i32_0 = arith.constant 0 : i32
    %c0_i32_1 = arith.constant 0 : i32
    return %c0_i32, %c0_i32_0 : i32, i32
  }
  func.func @transform_7(%arg0: i32) -> (i32, i32) {
    %c0_i32 = arith.constant 0 : i32
    %c0_i32_0 = arith.constant 0 : i32
    %c0_i32_1 = arith.constant 0 : i32
    return %c0_i32, %c0_i32_0 : i32, i32
  }
  func.func @transform_8(%arg0: i32) -> (i32, i32) {
    %c0_i32 = arith.constant 0 : i32
    %c0_i32_0 = arith.constant 0 : i32
    return %arg0, %c0_i32 : i32, i32
  }
}

</mosaic_0001>

<bundles_post_ra>
// kernel: tpu_custom_call.1
= control target key start
LH: loop header
LB: loop body
LE: loop exit
PB: predicated region body
PF: predicated region fallthrough
CT: control target
= control target key end

     0   :  { %13 = vsyncpa [#allocation3], 0  ;;  %s4703_s0 = inlined_call_operand.hbm [shape: f32[8,2,64], index: 0, kind: input, shape index: {}]   ;;  %s4704_s1 = inlined_call_operand.hbm [shape: f32[64,256], index: 1, kind: input, shape index: {}]   ;;  %s4705_s2 = inlined_call_operand.hbm [shape: f32[64,256], index: 2, kind: input, shape index: {}]   ;;  %s4706_s3 = inlined_call_operand.hbm [shape: f32[64,256], index: 3, kind: input, shape index: {}]   ;;  %s4707_s4 = inlined_call_operand.hbm [shape: f32[64,256], index: 4, kind: input, shape index: {}]   ;;  %s4708_s5 = inlined_call_operand.hbm [shape: f32[1,256], index: 5, kind: input, shape index: {}]   ;;  %s4709_s6 = inlined_call_operand.hbm [shape: f32[64,2], index: 6, kind: input, shape index: {}]   ;;  %s4710_s7 = inlined_call_operand.hbm [shape: f32[1,2], index: 7, kind: input, shape index: {}]   ;;  %s4711_s8 = inlined_call_operand.hbm [shape: f32[2,2], index: 8, kind: output, shape index: {}]  }
   0x1   :  { %14 = vsyncpa [#allocation6], 0 }
   0x2   :  { %15 = vsyncpa [#allocation9], 0 }
   0x3   :  { %16 = vsyncpa [#allocation12], 0 }
   0x4   :  { %17 = vsyncpa [#allocation15], 0 }
   0x5   :  { %18 = vsyncpa [#allocation4], 0  ;;  %s3955_s27 = smov [#allocation5]   ;;  %s3745_s9 = scalar_lea.hbm %s4704_s1, 2048 }
   0x6   :  { %s36_s28 = sshll.u32 %s3955_s27, 4  ;;  %p3746_p0 = scmp.ne.s32.totalorder %s4704_s1, %s3745_s9  ;;  %s37_s28 = int_to_ptr.vmem [resolvable:$true] %s36_s28 }
   0x7   :  { %p3749_p1 = scmp.lt.u32.totalorder %s3745_s9, %s4704_s1 }
   0x9   :  { %p3751_p2 = pnand %p3749_p1, %p3746_p0 }
   0xb   :  { %3754 = shalt.err (!%p3751_p2)
}
   0xc   :  { %s3755_s14 = scalar_lea.vmem %s37_s28, 2048  ;;  %p3760_p4 = scmp.lt.s32.totalorder %s37_s28, %s37_s28 }
   0xd   :  { %p3756_p3 = scmp.ne.s32.totalorder %s37_s28, %s3755_s14  ;;  %p3761_p5 = scmp.lt.s32.totalorder %s3755_s14, %s3755_s14 }
   0xf   :  { %p3762_p6 = por %p3761_p5, %p3760_p4 }
  0x11   :  { %p3763_p7 = pnand %p3762_p6, %p3756_p3 }
  0x13   :  { %3766 = shalt.err (!%p3763_p7)
}
  0x14   :  { %s3956_s15 = smov 256   ;;  %s3957_s16 = smov 16  }
  0x15   :  { %42 = dma.hbm_to_vmem [thread:$0]  %s4704_s1, 2048, %s37_s28, [#allocation6], %s3956_s15, %s3956_s15, %s3957_s16  }
  0x16   :  { %s3958_s19 = smov [#allocation8]   ;;  %s3959_s21 = smov [#allocation11]  }
  0x17   :  { %s60_s20 = sshll.u32 %s3958_s19, 4  ;;  %s85_s22 = sshll.u32 %s3959_s21, 4  ;;  %s61_s20 = int_to_ptr.vmem [resolvable:$true] %s60_s20  ;;  %s86_s22 = int_to_ptr.vmem [resolvable:$true] %s85_s22 }
  0x18   :  { %s3767_s25 = scalar_lea.hbm %s4706_s3, 2048 }
  0x19   :  { %p3768_p8 = scmp.ne.s32.totalorder %s4706_s3, %s3767_s25  ;;  %p3771_p9 = scmp.lt.u32.totalorder %s3767_s25, %s4706_s3 }
  0x1b   :  { %p3773_p10 = pnand %p3771_p9, %p3768_p8 }
  0x1d   :  { %3776 = shalt.err (!%p3773_p10)
}
  0x1e   :  { %s3777_s1 = scalar_lea.vmem %s61_s20, 2048  ;;  %p3782_p12 = scmp.lt.s32.totalorder %s61_s20, %s61_s20 }
  0x1f   :  { %p3778_p11 = scmp.ne.s32.totalorder %s61_s20, %s3777_s1  ;;  %p3783_p13 = scmp.lt.s32.totalorder %s3777_s1, %s3777_s1 }
  0x21   :  { %p3784_p0 = por %p3783_p13, %p3782_p12 }
  0x23   :  { %p3785_p1 = pnand %p3784_p0, %p3778_p11 }
  0x25   :  { %3788 = shalt.err (!%p3785_p1)
}
  0x26   :  { %66 = dma.hbm_to_vmem [thread:$0]  %s4706_s3, 2048, %s61_s20, [#allocation9], %s3956_s15, %s3956_s15, %s3957_s16  }
  0x27   :  { %s3789_s12 = scalar_lea.hbm %s4708_s5, 32 }
  0x28   :  { %p3790_p2 = scmp.ne.s32.totalorder %s4708_s5, %s3789_s12  ;;  %p3793_p3 = scmp.lt.u32.totalorder %s3789_s12, %s4708_s5 }
  0x2a   :  { %p3795_p4 = pnand %p3793_p3, %p3790_p2 }
  0x2c   :  { %3798 = shalt.err (!%p3795_p4)
}
  0x2d   :  { %s3799_s19 = scalar_lea.vmem %s86_s22, 32  ;;  %p3804_p6 = scmp.lt.s32.totalorder %s86_s22, %s86_s22 }
  0x2e   :  { %p3800_p5 = scmp.ne.s32.totalorder %s86_s22, %s3799_s19  ;;  %p3805_p7 = scmp.lt.s32.totalorder %s3799_s19, %s3799_s19 }
  0x30   :  { %p3806_p8 = por %p3805_p7, %p3804_p6 }
  0x32   :  { %p3807_p9 = pnand %p3806_p8, %p3800_p5 }
  0x34   :  { %3810 = shalt.err (!%p3807_p9)
}
  0x35   :  { %88 = dma.hbm_to_vmem [thread:$0]  %s4708_s5, 32, %s86_s22, [#allocation12]  }
  0x36   :  { %s3960_s21 = smov [#allocation2]   ;;  %s3811_s26 = scalar_lea.hbm %s4703_s0, 256 }
  0x37   :  { %s24_s23 = sshll.u32 %s3960_s21, 4  ;;  %p3812_p10 = scmp.ne.s32.totalorder %s4703_s0, %s3811_s26  ;;  %s25_s23 = int_to_ptr.vmem [resolvable:$true] %s24_s23 }
  0x38   :  { %p3815_p11 = scmp.lt.u32.totalorder %s3811_s26, %s4703_s0 }
  0x3a   :  { %p3817_p12 = pnand %p3815_p11, %p3812_p10 }
  0x3c   :  { %3820 = shalt.err (!%p3817_p12)
}
  0x3d   :  { %s3821_s28 = scalar_lea.vmem %s25_s23, 256  ;;  %p3826_p0 = scmp.lt.s32.totalorder %s25_s23, %s25_s23 }
  0x3e   :  { %p3822_p13 = scmp.ne.s32.totalorder %s25_s23, %s3821_s28  ;;  %p3827_p1 = scmp.lt.s32.totalorder %s3821_s28, %s3821_s28 }
  0x40   :  { %p3828_p2 = por %p3827_p1, %p3826_p0 }
  0x42   :  { %p3829_p3 = pnand %p3828_p2, %p3822_p13 }
  0x44   :  { %3832 = shalt.err (!%p3829_p3)
}
  0x45   :  { %s3961_s5 = smov 32   ;;  %s3962_s22 = smov 2  }
  0x46   :  { %30 = dma.hbm_to_vmem [thread:$0]  %s4703_s0, 256, %s25_s23, [#allocation3], %s3961_s5, %s3961_s5, %s3962_s22  }
  0x47   :  { %s3963_s11 = smov [#allocation7]   ;;  %s3964_s13 = smov [#allocation10]  }
  0x48   :  { %s48_s12 = sshll.u32 %s3963_s11, 4  ;;  %s72_s14 = sshll.u32 %s3964_s13, 4  ;;  %s49_s12 = int_to_ptr.vmem [resolvable:$true] %s48_s12  ;;  %s4074_s14 = int_to_ptr.vmem [resolvable:$true] %s72_s14 }
  0x49   :  { %s3833_s19 = scalar_lea.hbm %s4705_s2, 2048 }
  0x4a   :  { %p3834_p4 = scmp.ne.s32.totalorder %s4705_s2, %s3833_s19  ;;  %p3837_p5 = scmp.lt.u32.totalorder %s3833_s19, %s4705_s2 }
  0x4c   :  { %p3839_p6 = pnand %p3837_p5, %p3834_p4 }
  0x4e   :  { %3842 = shalt.err (!%p3839_p6)
}
  0x4f   :  { %s3843_s0 = scalar_lea.vmem %s49_s12, 2048  ;;  %p3848_p8 = scmp.lt.s32.totalorder %s49_s12, %s49_s12 }
  0x50   :  { %p3844_p7 = scmp.ne.s32.totalorder %s49_s12, %s3843_s0  ;;  %p3849_p9 = scmp.lt.s32.totalorder %s3843_s0, %s3843_s0 }
  0x52   :  { %p3850_p10 = por %p3849_p9, %p3848_p8 }
  0x54   :  { %p3851_p11 = pnand %p3850_p10, %p3844_p7 }
  0x56   :  { %3854 = shalt.err (!%p3851_p11)
}
  0x57   :  { %54 = dma.hbm_to_vmem [thread:$0]  %s4705_s2, 2048, %s49_s12, [#allocation6], %s3956_s15, %s3956_s15, %s3957_s16  }
  0x58   :  { %s3855_s29 = scalar_lea.hbm %s4707_s4, 2048 }
  0x59   :  { %p3856_p12 = scmp.ne.s32.totalorder %s4707_s4, %s3855_s29  ;;  %p3859_p13 = scmp.lt.u32.totalorder %s3855_s29, %s4707_s4 }
  0x5b   :  { %p3861_p0 = pnand %p3859_p13, %p3856_p12 }
  0x5d   :  { %3864 = shalt.err (!%p3861_p0)
}
  0x5e   :  { %s3865_s22 = scalar_lea.vmem %s4074_s14, 2048  ;;  %p3870_p2 = scmp.lt.s32.totalorder %s4074_s14, %s4074_s14 }
  0x5f   :  { %p3866_p1 = scmp.ne.s32.totalorder %s4074_s14, %s3865_s22  ;;  %p3871_p3 = scmp.lt.s32.totalorder %s3865_s22, %s3865_s22 }
  0x61   :  { %p3872_p4 = por %p3871_p3, %p3870_p2 }
  0x63   :  { %p3873_p5 = pnand %p3872_p4, %p3866_p1 }
  0x65   :  { %3876 = shalt.err (!%p3873_p5)
}
  0x66   :  { %78 = dma.hbm_to_vmem [thread:$0]  %s4707_s4, 2048, %s4074_s14, [#allocation9], %s3956_s15, %s3956_s15, %s3957_s16  }
  0x67   :  { %s3965_s10 = smov [#allocation13]   ;;  %s3877_s17 = scalar_lea.hbm %s4709_s6, 1024 }
  0x68   :  { %s94_s11 = sshll.u32 %s3965_s10, 4  ;;  %p3878_p6 = scmp.ne.s32.totalorder %s4709_s6, %s3877_s17  ;;  %s95_s11 = int_to_ptr.vmem [resolvable:$true] %s94_s11 }
  0x69   :  { %p3881_p7 = scmp.lt.u32.totalorder %s3877_s17, %s4709_s6 }
  0x6b   :  { %p3883_p8 = pnand %p3881_p7, %p3878_p6 }
  0x6d   :  { %3886 = shalt.err (!%p3883_p8)
}
  0x6e   :  { %s3887_s21 = scalar_lea.vmem %s95_s11, 1024  ;;  %p3892_p10 = scmp.lt.s32.totalorder %s95_s11, %s95_s11 }
  0x6f   :  { %p3888_p9 = scmp.ne.s32.totalorder %s95_s11, %s3887_s21  ;;  %p3893_p11 = scmp.lt.s32.totalorder %s3887_s21, %s3887_s21 }
  0x71   :  { %p3894_p12 = por %p3893_p11, %p3892_p10 }
  0x73   :  { %p3895_p13 = pnand %p3894_p12, %p3888_p9 }
  0x75   :  { %3898 = shalt.err (!%p3895_p13)
}
  0x76   :  { %s3966_s4 = smov 128   ;;  %s3967_s15 = smov 8  }
  0x77   :  { %100 = dma.hbm_to_vmem [thread:$0]  %s4709_s6, 1024, %s95_s11, [#allocation12], %s3966_s4, %s3966_s4, %s3967_s15  }
  0x78   :  { %s3968_s24 = smov [#allocation14]   ;;  %s3899_s26 = scalar_lea.hbm %s4710_s7, 16 }
  0x79   :  { %s107_s0 = sshll.u32 %s3968_s24, 4  ;;  %p3900_p0 = scmp.ne.s32.totalorder %s4710_s7, %s3899_s26  ;;  %s108_s0 = int_to_ptr.vmem [resolvable:$true] %s107_s0 }
  0x7a   :  { %p3903_p1 = scmp.lt.u32.totalorder %s3899_s26, %s4710_s7 }
  0x7c   :  { %p3905_p2 = pnand %p3903_p1, %p3900_p0 }
  0x7e   :  { %3908 = shalt.err (!%p3905_p2)
}
  0x7f   :  { %s3909_s28 = scalar_lea.vmem %s108_s0, 16  ;;  %s3913_s6 = scalar_lea.vmem %s108_s0, 32 }
  0x80   :  { %p3910_p3 = scmp.ne.s32.totalorder %s108_s0, %s3909_s28  ;;  %p3914_p4 = scmp.lt.s32.totalorder %s108_s0, %s108_s0 }
  0x81   :  { %p3915_p5 = scmp.lt.s32.totalorder %s3913_s6, %s3909_s28 }
  0x83   :  { %p3916_p6 = por %p3915_p5, %p3914_p4 }
  0x85   :  { %p3917_p7 = pnand %p3916_p6, %p3910_p3 }
  0x87   :  { %3920 = shalt.err (!%p3917_p7)
}
  0x88   :  { %110 = dma.hbm_to_vmem [thread:$0]  %s4710_s7, 16, %s108_s0, [#allocation15]  }
  0x89   :  { %3943 = dma.done.wait [#allocation3], 256  }
  0x8a   :  { %3944 = vsyncadd [#allocation3], 4294967040 }
  0x8b   :  { %3945 = dma.done.wait [#allocation6], 4096  }
  0x8c   :  { %3946 = vsyncadd [#allocation6], 4294963200 }
  0x8d   :  { %3947 = dma.done.wait [#allocation9], 4096  }
  0x8e   :  { %3948 = vsyncadd [#allocation9], 4294963200 }
  0x8f   :  { %3949 = dma.done.wait [#allocation12], 1056  }
  0x90   :  { %3950 = vsyncadd [#allocation12], 4294966240 }
  0x91   :  { %3951 = dma.done.wait [#allocation15], 16  }
  0x92   :  { %3952 = vsyncadd [#allocation15], 4294967280  ;;  %v3969_v0 = vmov 0.0   ;;  %v152_v1 = vld [vmem:[#allocation7 + $0x8] sm:$0xff]  ;;  %v154_v2 = vld [vmem:[#allocation7 + $0x18] sm:$0xff]  ;;  %vm225_vm0 = vcmask 523264   ;;  %v201_v50 = vlaneseq }
  0x93   :  { %364 = vmatprep.mubr.f32.mxu1 %v3969_v0  ;;  %293 = vmatprep.mubr.f32.mxu0 %v3969_v0  ;;  %v151_v3 = vld [vmem:[#allocation7] sm:$0xff]  ;;  %v4137_v4 = vpack.c.bf16 %v154_v2, %v152_v1  ;;  %v153_v5 = vld [vmem:[#allocation7 + $0x10] sm:$0xff]  ;;  %v156_v6 = vld [vmem:[#allocation7 + $0x28] sm:$0xff]  ;;  %v3970_v53 = vmov 0.5   ;;  %s3971_s7 = smov 64   ;;  %vm3973_vm2 = vmmov 0  }
  0x94   :  { %v158_v7 = vld [vmem:[#allocation7 + $0x38] sm:$0xff]  ;;  %v4139_v8 = vpack.c.bf16 %v153_v5, %v151_v3  ;;  %v155_v10 = vld [vmem:[#allocation7 + $0x20] sm:$0xff]  ;;  %v157_v11 = vld [vmem:[#allocation7 + $0x30] sm:$0xff]  ;;  %v212_v51 = vand.u32 127, %v201_v50  ;;  %s3974_s2 = smov [#allocation16]   ;;  %vm2992_vm3 = vcmask 9216  }
  0x95   :  { %v4141_v9 = vpack.c.bf16 %v158_v7, %v156_v6  ;;  %v160_v12 = vld [vmem:[#allocation7 + $0x48] sm:$0xff]  ;;  %3090 = vmatprep.subr.bf16.mxu1 %v4137_v4  ;;  %v162_v13 = vld [vmem:[#allocation7 + $0x58] sm:$0xff]  ;;  %v4145_v14 = vpack.c.bf16 %v157_v11, %v155_v10  ;;  %v159_v16 = vld [vmem:[#allocation7 + $0x40] sm:$0xff]  ;;  %s3000_s9 = sshll.u32 %s3974_s2, 4  ;;  %s3001_s9 = int_to_ptr.vmem [resolvable:$true] %s3000_s9 }
  0x96   :  { %3092 = vmatpush1.bf16.msra.mxu1 %v4139_v8  ;;  %v4148_v15 = vpack.c.bf16 %v162_v13, %v160_v12  ;;  %v161_v17 = vld [vmem:[#allocation7 + $0x50] sm:$0xff]  ;;  %v164_v18 = vld [vmem:[#allocation7 + $0x68] sm:$0xff]  ;;  %v166_v19 = vld [vmem:[#allocation7 + $0x78] sm:$0xff]  ;;  %v213_v52 = vadd.s32 128, %v212_v51  ;;  %s3921_s10 = scalar_lea.vmem %s3001_s9, 32  ;;  %p3926_p9 = scmp.lt.s32.totalorder %s3001_s9, %s3001_s9 }
  0x97   :  { %3094 = vmatprep.subr.bf16.mxu1 %v4141_v9  ;;  %v4151_v20 = vpack.c.bf16 %v161_v17, %v159_v16  ;;  %v4154_v21 = vpack.c.bf16 %v166_v19, %v164_v18  ;;  %v163_v22 = vld [vmem:[#allocation7 + $0x60] sm:$0xff]  ;;  %v165_v23 = vld [vmem:[#allocation7 + $0x70] sm:$0xff]  ;;  %v136_v24 = vld [vmem:[#allocation5 + $0x8] sm:$0xff]  ;;  %p3922_p8 = scmp.ne.s32.totalorder %s3001_s9, %s3921_s10  ;;  %p3927_p10 = scmp.lt.s32.totalorder %s3921_s10, %s3921_s10 }
  0x98   :  { %v138_v25 = vld [vmem:[#allocation5 + $0x18] sm:$0xff]  ;;  %v4157_v26 = vpack.c.bf16 %v165_v23, %v163_v22  ;;  %v135_v28 = vld [vmem:[#allocation5] sm:$0xff]  ;;  %v137_v29 = vld [vmem:[#allocation5 + $0x10] sm:$0xff]  ;;  %vm217_vm1 = vcmp.lt.s32.totalorder %v213_v52, 192 }
  0x99   :  { %v4160_v27 = vpack.c.bf16 %v138_v25, %v136_v24  ;;  %v140_v30 = vld [vmem:[#allocation5 + $0x28] sm:$0xff]  ;;  %v142_v31 = vld [vmem:[#allocation5 + $0x38] sm:$0xff]  ;;  %v4163_v32 = vpack.c.bf16 %v137_v29, %v135_v28  ;;  %v139_v34 = vld [vmem:[#allocation5 + $0x20] sm:$0xff]  ;;  %v4199_v54 = vsel %vm217_vm1, 1.0, %v3970_v53  ;;  %v4202_v62 = vsel %vm217_vm1, 0.0, %v3970_v53  ;;  %p3928_p11 = por %p3927_p10, %p3926_p9 }
  0x9a   :  { %3096 = vmatpush1.bf16.msra.mxu1 %v4145_v14  ;;  %v4166_v33 = vpack.c.bf16 %v142_v31, %v140_v30  ;;  %v141_v35 = vld [vmem:[#allocation5 + $0x30] sm:$0xff]  ;;  %v144_v36 = vld [vmem:[#allocation5 + $0x48] sm:$0xff]  ;;  %v146_v37 = vld [vmem:[#allocation5 + $0x58] sm:$0xff] }
  0x9b   :  { %3098 = vmatprep.subr.bf16.mxu1 %v4148_v15  ;;  %v4170_v38 = vpack.c.bf16 %v141_v35, %v139_v34  ;;  %v4174_v39 = vpack.c.bf16 %v146_v37, %v144_v36  ;;  %v143_v40 = vld [vmem:[#allocation5 + $0x40] sm:$0xff]  ;;  %v145_v41 = vld [vmem:[#allocation5 + $0x50] sm:$0xff]  ;;  %v148_v42 = vld [vmem:[#allocation5 + $0x68] sm:$0xff]  ;;  %p3929_p12 = pnand %p3928_p11, %p3922_p8 }
  0x9c   :  { %v150_v43 = vld [vmem:[#allocation5 + $0x78] sm:$0xff]  ;;  %v4177_v44 = vpack.c.bf16 %v145_v41, %v143_v40  ;;  %v147_v46 = vld [vmem:[#allocation5 + $0x60] sm:$0xff]  ;;  %v149_v47 = vld [vmem:[#allocation5 + $0x70] sm:$0xff] }
  0x9d   :  { %v4180_v45 = vpack.c.bf16 %v150_v43, %v148_v42  ;;  %v4183_v48 = vpack.c.bf16 %v149_v47, %v147_v46  ;;  %v224_v49 = vld [vmem:[#allocation2] sm:$0x3]  ;;  %v184_v5 = vld [vmem:[#allocation10 + $0x8] sm:$0xff]  ;;  %v186_v6 = vld [vmem:[#allocation10 + $0x18] sm:$0xff] }
  0x9e   :  { %3100 = vmatpush1.bf16.msra.mxu1 %v4151_v20  ;;  %v183_v7 = vld [vmem:[#allocation10] sm:$0xff]  ;;  %v4213_v10 = vpack.c.bf16 %v186_v6, %v184_v5  ;;  %v185_v11 = vld [vmem:[#allocation10 + $0x10] sm:$0xff]  ;;  %v188_v12 = vld [vmem:[#allocation10 + $0x28] sm:$0xff] }
  0x9f   :  { %3102 = vmatprep.subr.bf16.mxu1 %v4154_v21  ;;  %v190_v13 = vld [vmem:[#allocation10 + $0x38] sm:$0xff]  ;;  %v4215_v16 = vpack.c.bf16 %v185_v11, %v183_v7  ;;  %v187_v18 = vld [vmem:[#allocation10 + $0x20] sm:$0xff]  ;;  %v189_v19 = vld [vmem:[#allocation10 + $0x30] sm:$0xff] }
  0xa0   :  { %v4217_v17 = vpack.c.bf16 %v190_v13, %v188_v12  ;;  %v192_v22 = vld [vmem:[#allocation10 + $0x48] sm:$0xff]  ;;  %3074 = vmatprep.subr.bf16.mxu0 %v4213_v10  ;;  %v194_v23 = vld [vmem:[#allocation10 + $0x58] sm:$0xff]  ;;  %v4221_v24 = vpack.c.bf16 %v189_v19, %v187_v18  ;;  %v191_v28 = vld [vmem:[#allocation10 + $0x40] sm:$0xff] }
  0xa1   :  { %3076 = vmatpush1.bf16.msra.mxu0 %v4215_v16  ;;  %v4224_v25 = vpack.c.bf16 %v194_v23, %v192_v22  ;;  %v193_v29 = vld [vmem:[#allocation10 + $0x50] sm:$0xff]  ;;  %v196_v30 = vld [vmem:[#allocation10 + $0x68] sm:$0xff]  ;;  %v198_v31 = vld [vmem:[#allocation10 + $0x78] sm:$0xff] }
  0xa2   :  { %3104 = vmatpush1.bf16.msra.mxu1 %v4157_v26  ;;  %3078 = vmatprep.subr.bf16.mxu0 %v4217_v17  ;;  %v4227_v34 = vpack.c.bf16 %v193_v29, %v191_v28  ;;  %v4230_v35 = vpack.c.bf16 %v198_v31, %v196_v30  ;;  %v195_v36 = vld [vmem:[#allocation10 + $0x60] sm:$0xff]  ;;  %v197_v37 = vld [vmem:[#allocation10 + $0x70] sm:$0xff]  ;;  %v168_v40 = vld [vmem:[#allocation8 + $0x8] sm:$0xff] }
  0xa3   :  { %3106 = vmatprep.subr.bf16.mxu1 %v4160_v27  ;;  %v170_v41 = vld [vmem:[#allocation8 + $0x18] sm:$0xff]  ;;  %v4233_v42 = vpack.c.bf16 %v197_v37, %v195_v36  ;;  %v167_v46 = vld [vmem:[#allocation8] sm:$0xff]  ;;  %v169_v47 = vld [vmem:[#allocation8 + $0x10] sm:$0xff] }
  0xa4   :  { %v4236_v43 = vpack.c.bf16 %v170_v41, %v168_v40  ;;  %v174_v51 = vld [vmem:[#allocation8 + $0x38] sm:$0xff]  ;;  %v4239_v52 = vpack.c.bf16 %v169_v47, %v167_v46  ;;  %v179_v11 = vld [vmem:[#allocation8 + $0x60] sm:$0xff]  ;;  %v181_v12 = vld [vmem:[#allocation8 + $0x70] sm:$0xff] }
  0xa5   :  { %365 = vmatmul.mubr.f32.vlgmr.msra.gmra.mrb[0].mxu1 %v3969_v0  ;;  %3080 = vmatpush1.bf16.msra.mxu0 %v4221_v24  ;;  %v182_v5 = vld [vmem:[#allocation8 + $0x78] sm:$0xff]  ;;  %v4259_v13 = vpack.c.bf16 %v181_v12, %v179_v11  ;;  %v199_v31 = vld [vmem:[#allocation11] sm:$0x3] }
  0xa6   :  { %3108 = vmatpush1.bf16.msra.mxu1 %v4163_v32  ;;  %438 = vmatprep.mubr.f32.mxu1 %v3969_v0 }
  0xa7   :  { %3110 = vmatprep.subr.bf16.mxu1 %v4166_v33  ;;  %3082 = vmatprep.subr.bf16.mxu0 %v4224_v25 }
  0xa9   :  { %3084 = vmatpush1.bf16.msra.mxu0 %v4227_v34 }
  0xaa   :  { %3112 = vmatpush1.bf16.msra.mxu1 %v4170_v38  ;;  %3086 = vmatprep.subr.bf16.mxu0 %v4230_v35 }
  0xab   :  { %3114 = vmatprep.subr.bf16.mxu1 %v4174_v39 }
  0xad   :  { %3088 = vmatpush1.bf16.msra.mxu0 %v4233_v42 }
  0xae   :  { %3116 = vmatpush1.bf16.msra.mxu1 %v4177_v44  ;;  %3122 = vmatprep.subr.bf16.mxu0 %v4236_v43 }
  0xaf   :  { %3118 = vmatprep.subr.bf16.mxu1 %v4180_v45 }
  0xb0   :  { %294 = vmatmul.mubr.f32.vlgmr.msra.gmra.mrb[0].mxu0 %v3969_v0 }
  0xb1   :  { %3124 = vmatpush1.bf16.msra.mxu0 %v4239_v52  ;;  %531 = vmatprep.mubr.f32.mxu0 %v3969_v0 }
  0xb2   :  { %3120 = vmatpush1.bf16.msra.mxu1 %v4183_v48 }
  0xb3   :  { %3154 = vmatprep.subr.bf16.mxu1 %v4137_v4 }
  0xb5   :  { %3013 = vmatmul.mubr.msk.f32.vlgmr.msra.gmra.mrb[0].mxu1 %vm225_vm0, %v224_v49  ;;  %v172_v49 = vld [vmem:[#allocation8 + $0x28] sm:$0xff] }
  0xb6   :  { %3156 = vmatpush1.bf16.msra.mxu1 %v4139_v8  ;;  %699 = vmatprep.mubr.f32.mxu1 %v3969_v0  ;;  %v4242_v53 = vpack.c.bf16 %v174_v51, %v172_v49 }
  0xb7   :  { %3158 = vmatprep.subr.bf16.mxu1 %v4141_v9 }
  0xb8   :  { %3126 = vmatprep.subr.bf16.mxu0 %v4242_v53 }
  0xba   :  { %3160 = vmatpush1.bf16.msra.mxu1 %v4145_v14 }
  0xbb   :  { %3162 = vmatprep.subr.bf16.mxu1 %v4148_v15 }
  0xbe   :  { %3164 = vmatpush1.bf16.msra.mxu1 %v4151_v20 }
  0xbf   :  { %3166 = vmatprep.subr.bf16.mxu1 %v4154_v21 }
  0xc2   :  { %3168 = vmatpush1.bf16.msra.mxu1 %v4157_v26 }
  0xc3   :  { %3170 = vmatprep.subr.bf16.mxu1 %v4160_v27 }
 0x188   :  { %v440_v55 = vpop.f32.mrb[0].mxu1 }
 0x189   :  { %v445_v56 = vmul.f32 0.5, %v440_v55  ;;  %v442_v57 = vpop.f32.mrb[1].mxu1  ;;  %v171_v55 = vld [vmem:[#allocation8 + $0x20] sm:$0xff] }
 0x18a   :  { %v446_v58 = vmul.f32 %v442_v57, %v4199_v54  ;;  %v176_v57 = vld [vmem:[#allocation8 + $0x48] sm:$0xff] }
 0x18b   :  { %3649 = vtanh.f32 %v445_v56  ;;  %v173_v56 = vld [vmem:[#allocation8 + $0x30] sm:$0xff] }
 0x18c   :  { %3651 = vtanh.f32 %v446_v58  ;;  %v178_v58 = vld [vmem:[#allocation8 + $0x58] sm:$0xff] }
 0x195   :  { %v3650_v59 = vpop.eup %3649 }
 0x196   :  { %v3652_v60 = vpop.eup %3651  ;;  %v449_v61 = vmul.f32 0.5, %v3650_v59  ;;  %v4246_v59 = vpack.c.bf16 %v173_v56, %v171_v55 }
 0x197   :  { %v450_v63 = vmul.f32 %v3652_v60, %v4199_v54  ;;  %v4250_v60 = vpack.c.bf16 %v178_v58, %v176_v57 }
 0x198   :  { %v4205_v1 = vadd.f32 0.5, %v449_v61  ;;  %v175_v61 = vld [vmem:[#allocation8 + $0x40] sm:$0xff]  ;;  %3128 = vmatpush1.bf16.msra.mxu0 %v4246_v59 }
 0x199   :  { %v4208_v2 = vadd.f32 %v450_v63, %v4202_v62  ;;  %v177_v63 = vld [vmem:[#allocation8 + $0x50] sm:$0xff]  ;;  %3130 = vmatprep.subr.bf16.mxu0 %v4250_v60 }
 0x19a   :  { %v4253_v6 = vpack.c.bf16 %v177_v63, %v175_v61  ;;  %v453_v18 = vmul.f32 0.0, %v4205_v1 }
 0x19b   :  { %v454_v3 = vmul.f32 %v4208_v2, %v4205_v1  ;;  %v558_v1 = vld [vmem:[#allocation2 + $0x2] sm:$0x3] }
 0x19c   :  { %3132 = vmatpush1.bf16.msra.mxu0 %v4253_v6 }
 0x19d   :  { %456 = vrot.lane.b32.xlu0 %v454_v3, %s3971_s7  ;;  %v180_v3 = vld [vmem:[#allocation8 + $0x68] sm:$0xff] }
 0x19e   :  { %v4256_v7 = vpack.c.bf16 %v182_v5, %v180_v3 }
 0x1a0   :  { %3134 = vmatprep.subr.bf16.mxu0 %v4256_v7 }
 0x1a1   :  { %3136 = vmatpush1.bf16.msra.mxu0 %v4259_v13 }
 0x1a2   :  { %3138 = vmatprep.subr.bf16.mxu0 %v4213_v10 }
 0x20f   :  { %v457_v19 = vpop.permute.xlu0 %456 }
 0x210   :  { %v4265_v22 = vadd.f32 %v457_v19, %v453_v18 }
 0x212   :  { %3653 = vtanh.f32 %v4265_v22 }
 0x21c   :  { %v3654_v23 = vpop.eup %3653 }
 0x21d   :  { %v461_v28 = vmul.f32 %v3654_v23, %v4208_v2  ;;  %v202_v2 = vshrl.u32 %v201_v50, 7 }
 0x21f   :  { %463 = vrot.lane.b32.xlu0 %v461_v28, %s3971_s7  ;;  %v203_v30 = vsub.s32 0, %v202_v2  ;;  %v207_v36 = vsub.s32 1, %v202_v2 }
 0x221   :  { %v4301_v37 = vrot.slane %v199_v31, %v203_v30  ;;  %v4303_v40 = vrot.slane %v199_v31, %v207_v36 }
 0x291   :  { %v464_v29 = vpop.permute.xlu0 %463 }
 0x292   :  { %3014 = vmatmul.mubr.msk.f32.vlgmr.msra.gmra.mrb[0].mxu0 %vm225_vm0, %v464_v29  ;;  %3016 = vmatmul.mubr.msk.f32.vlgmr.msra.gmra.mrb[2].mxu1 %vm225_vm0, %v464_v29 }
 0x293   :  { %3172 = vmatpush1.bf16.msra.mxu1 %v4163_v32  ;;  %773 = vmatprep.mubr.f32.mxu1 %v3969_v0 }
 0x294   :  { %3174 = vmatprep.subr.bf16.mxu1 %v4166_v33  ;;  %3140 = vmatpush1.bf16.msra.mxu0 %v4215_v16 }
 0x295   :  { %3142 = vmatprep.subr.bf16.mxu0 %v4217_v17  ;;  %628 = vmatprep.mubr.f32.mxu0 %v3969_v0 }
 0x297   :  { %3176 = vmatpush1.bf16.msra.mxu1 %v4170_v38 }
 0x298   :  { %3178 = vmatprep.subr.bf16.mxu1 %v4174_v39  ;;  %3144 = vmatpush1.bf16.msra.mxu0 %v4221_v24 }
 0x299   :  { %3146 = vmatprep.subr.bf16.mxu0 %v4224_v25 }
 0x29b   :  { %3180 = vmatpush1.bf16.msra.mxu1 %v4177_v44 }
 0x29c   :  { %3182 = vmatprep.subr.bf16.mxu1 %v4180_v45  ;;  %3148 = vmatpush1.bf16.msra.mxu0 %v4227_v34 }
 0x29d   :  { %3150 = vmatprep.subr.bf16.mxu0 %v4230_v35 }
 0x29f   :  { %3184 = vmatpush1.bf16.msra.mxu1 %v4183_v48 }
 0x2a0   :  { %3152 = vmatpush1.bf16.msra.mxu0 %v4233_v42  ;;  %3218 = vmatprep.subr.bf16.mxu1 %v4137_v4 }
 0x2a1   :  { %3186 = vmatprep.subr.bf16.mxu0 %v4236_v43 }
 0x2a2   :  { %3017 = vmatmul.mubr.msk.f32.vlgmr.msra.gmra.mrb[2].mxu1 %vm225_vm0, %v558_v1 }
 0x2a3   :  { %3220 = vmatpush1.bf16.msra.mxu1 %v4139_v8  ;;  %1034 = vmatprep.mubr.f32.mxu1 %v3969_v0 }
 0x2a4   :  { %3222 = vmatprep.subr.bf16.mxu1 %v4141_v9 }
 0x2a7   :  { %3224 = vmatpush1.bf16.msra.mxu1 %v4145_v14 }
 0x2a8   :  { %3226 = vmatprep.subr.bf16.mxu1 %v4148_v15 }
 0x2ab   :  { %3228 = vmatpush1.bf16.msra.mxu1 %v4151_v20 }
 0x2ac   :  { %3230 = vmatprep.subr.bf16.mxu1 %v4154_v21 }
 0x2af   :  { %3232 = vmatpush1.bf16.msra.mxu1 %v4157_v26 }
 0x2b0   :  { %3234 = vmatprep.subr.bf16.mxu1 %v4160_v27 }
 0x365   :  { %v533_v41 = vpop.f32.mrb[0].mxu0 }
 0x366   :  { %v538_v46 = vadd.f32 %v533_v41, %v4301_v37  ;;  %v535_v47 = vpop.f32.mrb[1].mxu0 }
 0x367   :  { %v539_v49 = vadd.f32 %v535_v47, %v4303_v40 }
 0x368   :  { %v540_v51 = vmul.f32 0.5, %v538_v46 }
 0x369   :  { %v541_v55 = vmul.f32 %v539_v49, %v4199_v54 }
 0x36a   :  { %3655 = vtanh.f32 %v540_v51 }
 0x36b   :  { %3657 = vtanh.f32 %v541_v55 }
 0x374   :  { %v3656_v56 = vpop.eup %3655 }
 0x375   :  { %v3658_v50 = vpop.eup %3657  ;;  %v775_v57 = vpop.f32.mrb[2].mxu1  ;;  %v544_v58 = vmul.f32 0.5, %v3656_v56 }
 0x376   :  { %v780_v61 = vmul.f32 0.5, %v775_v57  ;;  %v777_v63 = vpop.f32.mrb[3].mxu1  ;;  %v545_v3 = vmul.f32 %v3658_v50, %v4199_v54 }
 0x377   :  { %v781_v5 = vmul.f32 %v777_v63, %v4199_v54  ;;  %v546_v11 = vadd.f32 0.5, %v544_v58  ;;  %v893_v58 = vld [vmem:[#allocation2 + $0x4] sm:$0x3] }
 0x378   :  { %3659 = vtanh.f32 %v780_v61  ;;  %v547_v12 = vadd.f32 %v545_v3, %v4202_v62 }
 0x379   :  { %3661 = vtanh.f32 %v781_v5  ;;  %v548_v31 = vmul.f32 0.0, %v546_v11 }
 0x37a   :  { %v549_v18 = vmul.f32 %v547_v12, %v546_v11 }
 0x37c   :  { %551 = vrot.lane.b32.xlu1 %v549_v18, %s3971_s7 }
 0x382   :  { %v3660_v19 = vpop.eup %3659 }
 0x383   :  { %v3662_v23 = vpop.eup %3661  ;;  %v784_v28 = vmul.f32 0.5, %v3660_v19 }
 0x384   :  { %v785_v29 = vmul.f32 %v3662_v23, %v4199_v54 }
 0x385   :  { %v786_v1 = vadd.f32 0.5, %v784_v28 }
 0x386   :  { %v787_v2 = vadd.f32 %v785_v29, %v4202_v62 }
 0x387   :  { %v788_v47 = vmul.f32 %v786_v1, %v4265_v22 }
 0x388   :  { %v789_v30 = vmul.f32 %v787_v2, %v786_v1 }
 0x38a   :  { %791 = vrot.lane.b32.xlu1 %v789_v30, %s3971_s7 }
 0x3ee   :  { %v552_v36 = vpop.permute.xlu1 %551 }
 0x3ef   :  { %v4315_v41 = vadd.f32 %v552_v36, %v548_v31 }
 0x3f1   :  { %3663 = vtanh.f32 %v4315_v41 }
 0x3fb   :  { %v3664_v46 = vpop.eup %3663 }
 0x3fc   :  { %v792_v49 = vpop.permute.xlu1 %791  ;;  %v556_v51 = vmul.f32 %v3664_v46, %v547_v12 }
 0x3fd   :  { %v4319_v55 = vadd.f32 %v792_v49, %v788_v47 }
 0x3fe   :  { %560 = vrot.lane.b32.xlu0 %v556_v51, %s3971_s7 }
 0x3ff   :  { %3665 = vtanh.f32 %v4319_v55 }
 0x409   :  { %v3666_v56 = vpop.eup %3665 }
 0x40a   :  { %v796_v50 = vmul.f32 %v3666_v56, %v787_v2 }
 0x40c   :  { %798 = vrot.lane.b32.xlu1 %v796_v50, %s3971_s7 }
 0x470   :  { %v561_v57 = vpop.permute.xlu0 %560 }
 0x471   :  { %3015 = vmatmul.mubr.msk.f32.vlgmr.msra.gmra.mrb[2].mxu0 %vm225_vm0, %v561_v57 }
 0x472   :  { %3188 = vmatpush1.bf16.msra.mxu0 %v4239_v52  ;;  %866 = vmatprep.mubr.f32.mxu0 %v3969_v0 }
 0x473   :  { %3190 = vmatprep.subr.bf16.mxu0 %v4242_v53 }
 0x476   :  { %3192 = vmatpush1.bf16.msra.mxu0 %v4246_v59 }
 0x477   :  { %3194 = vmatprep.subr.bf16.mxu0 %v4250_v60 }
 0x47a   :  { %3196 = vmatpush1.bf16.msra.mxu0 %v4253_v6 }
 0x47b   :  { %3198 = vmatprep.subr.bf16.mxu0 %v4256_v7 }
 0x47e   :  { %3200 = vmatpush1.bf16.msra.mxu0 %v4259_v13  ;;  %v799_v22 = vpop.permute.xlu1 %798 }
 0x47f   :  { %3020 = vmatmul.mubr.msk.f32.vlgmr.msra.gmra.mrb[4].mxu1 %vm225_vm0, %v799_v22  ;;  %3202 = vmatprep.subr.bf16.mxu0 %v4213_v10 }
 0x480   :  { %3236 = vmatpush1.bf16.msra.mxu1 %v4163_v32  ;;  %1108 = vmatprep.mubr.f32.mxu1 %v3969_v0 }
 0x481   :  { %3018 = vmatmul.mubr.msk.f32.vlgmr.msra.gmra.mrb[2].mxu0 %vm225_vm0, %v799_v22  ;;  %3238 = vmatprep.subr.bf16.mxu1 %v4166_v33 }
 0x482   :  { %3204 = vmatpush1.bf16.msra.mxu0 %v4215_v16  ;;  %963 = vmatprep.mubr.f32.mxu0 %v3969_v0 }
 0x483   :  { %3206 = vmatprep.subr.bf16.mxu0 %v4217_v17 }
 0x484   :  { %3240 = vmatpush1.bf16.msra.mxu1 %v4170_v38 }
 0x485   :  { %3242 = vmatprep.subr.bf16.mxu1 %v4174_v39 }
 0x486   :  { %3208 = vmatpush1.bf16.msra.mxu0 %v4221_v24 }
 0x487   :  { %3210 = vmatprep.subr.bf16.mxu0 %v4224_v25 }
 0x488   :  { %3244 = vmatpush1.bf16.msra.mxu1 %v4177_v44 }
 0x489   :  { %3246 = vmatprep.subr.bf16.mxu1 %v4180_v45 }
 0x48a   :  { %3212 = vmatpush1.bf16.msra.mxu0 %v4227_v34 }
 0x48b   :  { %3214 = vmatprep.subr.bf16.mxu0 %v4230_v35 }
 0x48c   :  { %3248 = vmatpush1.bf16.msra.mxu1 %v4183_v48 }
 0x48d   :  { %3282 = vmatprep.subr.bf16.mxu1 %v4137_v4 }
 0x48e   :  { %3216 = vmatpush1.bf16.msra.mxu0 %v4233_v42 }
 0x48f   :  { %3021 = vmatmul.mubr.msk.f32.vlgmr.msra.gmra.mrb[4].mxu1 %vm225_vm0, %v893_v58  ;;  %3250 = vmatprep.subr.bf16.mxu0 %v4236_v43 }
 0x490   :  { %3284 = vmatpush1.bf16.msra.mxu1 %v4139_v8  ;;  %1369 = vmatprep.mubr.f32.mxu1 %v3969_v0 }
 0x491   :  { %3286 = vmatprep.subr.bf16.mxu1 %v4141_v9 }
 0x494   :  { %3288 = vmatpush1.bf16.msra.mxu1 %v4145_v14 }
 0x495   :  { %3290 = vmatprep.subr.bf16.mxu1 %v4148_v15 }
 0x498   :  { %3292 = vmatpush1.bf16.msra.mxu1 %v4151_v20 }
 0x499   :  { %3294 = vmatprep.subr.bf16.mxu1 %v4154_v21 }
 0x49c   :  { %3296 = vmatpush1.bf16.msra.mxu1 %v4157_v26 }
 0x49d   :  { %3298 = vmatprep.subr.bf16.mxu1 %v4160_v27 }
 0x554   :  { %v868_v61 = vpop.f32.mrb[2].mxu0 }
 0x555   :  { %v873_v63 = vadd.f32 %v868_v61, %v4301_v37  ;;  %v870_v3 = vpop.f32.mrb[3].mxu0 }
 0x556   :  { %v874_v5 = vadd.f32 %v870_v3, %v4303_v40 }
 0x557   :  { %v875_v11 = vmul.f32 0.5, %v873_v63 }
 0x558   :  { %v876_v12 = vmul.f32 %v874_v5, %v4199_v54 }
 0x559   :  { %3667 = vtanh.f32 %v875_v11 }
 0x55a   :  { %3669 = vtanh.f32 %v876_v12 }
 0x562   :  { %v1110_v18 = vpop.f32.mrb[4].mxu1 }
 0x563   :  { %v3668_v19 = vpop.eup %3667  ;;  %v1115_v23 = vmul.f32 0.5, %v1110_v18  ;;  %v1112_v28 = vpop.f32.mrb[5].mxu1 }
 0x564   :  { %v3670_v29 = vpop.eup %3669  ;;  %v879_v1 = vmul.f32 0.5, %v3668_v19  ;;  %v1116_v2 = vmul.f32 %v1112_v28, %v4199_v54  ;;  %v1228_v28 = vld [vmem:[#allocation2 + $0x6] sm:$0x3] }
 0x565   :  { %3671 = vtanh.f32 %v1115_v23  ;;  %v880_v30 = vmul.f32 %v3670_v29, %v4199_v54 }
 0x566   :  { %v881_v31 = vadd.f32 0.5, %v879_v1  ;;  %3673 = vtanh.f32 %v1116_v2 }
 0x567   :  { %v882_v36 = vadd.f32 %v880_v30, %v4202_v62 }
 0x568   :  { %v883_v58 = vmul.f32 %v881_v31, %v4315_v41 }
 0x569   :  { %v884_v46 = vmul.f32 %v882_v36, %v881_v31 }
 0x56b   :  { %886 = vrot.lane.b32.xlu0 %v884_v46, %s3971_s7 }
 0x56f   :  { %v3672_v47 = vpop.eup %3671 }
 0x570   :  { %v3674_v49 = vpop.eup %3673  ;;  %v1119_v51 = vmul.f32 0.5, %v3672_v47 }
 0x571   :  { %v1120_v56 = vmul.f32 %v3674_v49, %v4199_v54 }
 0x572   :  { %v1121_v50 = vadd.f32 0.5, %v1119_v51 }
 0x573   :  { %v1122_v57 = vadd.f32 %v1120_v56, %v4202_v62 }
 0x574   :  { %v1123_v3 = vmul.f32 %v1121_v50, %v4319_v55 }
 0x575   :  { %v1124_v22 = vmul.f32 %v1122_v57, %v1121_v50 }
 0x577   :  { %1126 = vrot.lane.b32.xlu1 %v1124_v22, %s3971_s7 }
 0x5dd   :  { %v887_v61 = vpop.permute.xlu0 %886 }
 0x5de   :  { %v4375_v63 = vadd.f32 %v887_v61, %v883_v58 }
 0x5e0   :  { %3675 = vtanh.f32 %v4375_v63 }
 0x5e9   :  { %v1127_v5 = vpop.permute.xlu1 %1126 }
 0x5ea   :  { %v3676_v11 = vpop.eup %3675  ;;  %v4379_v12 = vadd.f32 %v1127_v5, %v1123_v3 }
 0x5eb   :  { %v891_v18 = vmul.f32 %v3676_v11, %v882_v36 }
 0x5ec   :  { %3677 = vtanh.f32 %v4379_v12 }
 0x5ed   :  { %895 = vrot.lane.b32.xlu0 %v891_v18, %s3971_s7 }
 0x5f6   :  { %v3678_v19 = vpop.eup %3677 }
 0x5f7   :  { %v1131_v23 = vmul.f32 %v3678_v19, %v1122_v57 }
 0x5f9   :  { %1133 = vrot.lane.b32.xlu1 %v1131_v23, %s3971_s7 }
 0x65f   :  { %v896_v41 = vpop.permute.xlu0 %895 }
 0x660   :  { %3019 = vmatmul.mubr.msk.f32.vlgmr.msra.gmra.mrb[4].mxu0 %vm225_vm0, %v896_v41 }
 0x661   :  { %3252 = vmatpush1.bf16.msra.mxu0 %v4239_v52  ;;  %1201 = vmatprep.mubr.f32.mxu0 %v3969_v0 }
 0x662   :  { %3254 = vmatprep.subr.bf16.mxu0 %v4242_v53 }
 0x665   :  { %3256 = vmatpush1.bf16.msra.mxu0 %v4246_v59 }
 0x666   :  { %3258 = vmatprep.subr.bf16.mxu0 %v4250_v60 }
 0x669   :  { %3260 = vmatpush1.bf16.msra.mxu0 %v4253_v6 }
 0x66a   :  { %3262 = vmatprep.subr.bf16.mxu0 %v4256_v7 }
 0x66b   :  { %v1134_v55 = vpop.permute.xlu1 %1133 }
 0x66c   :  { %3024 = vmatmul.mubr.msk.f32.vlgmr.msra.gmra.mrb[6].mxu1 %vm225_vm0, %v1134_v55 }
 0x66d   :  { %3300 = vmatpush1.bf16.msra.mxu1 %v4163_v32  ;;  %3264 = vmatpush1.bf16.msra.mxu0 %v4259_v13 }
 0x66e   :  { %3302 = vmatprep.subr.bf16.mxu1 %v4166_v33  ;;  %1443 = vmatprep.mubr.f32.mxu1 %v3969_v0 }
 0x66f   :  { %3266 = vmatprep.subr.bf16.mxu0 %v4213_v10 }
 0x670   :  { %3022 = vmatmul.mubr.msk.f32.vlgmr.msra.gmra.mrb[4].mxu0 %vm225_vm0, %v1134_v55 }
 0x671   :  { %3304 = vmatpush1.bf16.msra.mxu1 %v4170_v38  ;;  %3268 = vmatpush1.bf16.msra.mxu0 %v4215_v16 }
 0x672   :  { %3306 = vmatprep.subr.bf16.mxu1 %v4174_v39  ;;  %3270 = vmatprep.subr.bf16.mxu0 %v4217_v17 }
 0x673   :  { %1298 = vmatprep.mubr.f32.mxu0 %v3969_v0 }
 0x675   :  { %3308 = vmatpush1.bf16.msra.mxu1 %v4177_v44  ;;  %3272 = vmatpush1.bf16.msra.mxu0 %v4221_v24 }
 0x676   :  { %3310 = vmatprep.subr.bf16.mxu1 %v4180_v45  ;;  %3274 = vmatprep.subr.bf16.mxu0 %v4224_v25 }
 0x679   :  { %3312 = vmatpush1.bf16.msra.mxu1 %v4183_v48  ;;  %3276 = vmatpush1.bf16.msra.mxu0 %v4227_v34 }
 0x67a   :  { %3346 = vmatprep.subr.bf16.mxu1 %v4137_v4  ;;  %3278 = vmatprep.subr.bf16.mxu0 %v4230_v35 }
 0x67c   :  { %3025 = vmatmul.mubr.msk.f32.vlgmr.msra.gmra.mrb[6].mxu1 %vm225_vm0, %v1228_v28 }
 0x67d   :  { %3348 = vmatpush1.bf16.msra.mxu1 %v4139_v8  ;;  %3280 = vmatpush1.bf16.msra.mxu0 %v4233_v42 }
 0x67e   :  { %3350 = vmatprep.subr.bf16.mxu1 %v4141_v9  ;;  %3314 = vmatprep.subr.bf16.mxu0 %v4236_v43 }
 0x67f   :  { %1704 = vmatprep.mubr.f32.mxu1 %v3969_v0 }
 0x681   :  { %3352 = vmatpush1.bf16.msra.mxu1 %v4145_v14 }
 0x682   :  { %3354 = vmatprep.subr.bf16.mxu1 %v4148_v15 }
 0x685   :  { %3356 = vmatpush1.bf16.msra.mxu1 %v4151_v20 }
 0x686   :  { %3358 = vmatprep.subr.bf16.mxu1 %v4154_v21 }
 0x689   :  { %3360 = vmatpush1.bf16.msra.mxu1 %v4157_v26 }
 0x68a   :  { %3362 = vmatprep.subr.bf16.mxu1 %v4160_v27 }
 0x743   :  { %v1203_v29 = vpop.f32.mrb[4].mxu0 }
 0x744   :  { %v1208_v1 = vadd.f32 %v1203_v29, %v4301_v37  ;;  %v1205_v2 = vpop.f32.mrb[5].mxu0 }
 0x745   :  { %v1209_v30 = vadd.f32 %v1205_v2, %v4303_v40 }
 0x746   :  { %v1210_v31 = vmul.f32 0.5, %v1208_v1 }
 0x747   :  { %v1211_v36 = vmul.f32 %v1209_v30, %v4199_v54 }
 0x748   :  { %3679 = vtanh.f32 %v1210_v31 }
 0x749   :  { %3681 = vtanh.f32 %v1211_v36 }
 0x74f   :  { %v1445_v46 = vpop.f32.mrb[6].mxu1 }
 0x750   :  { %v1450_v47 = vmul.f32 0.5, %v1445_v46  ;;  %v1447_v49 = vpop.f32.mrb[7].mxu1 }
 0x751   :  { %v1451_v51 = vmul.f32 %v1447_v49, %v4199_v54 }
 0x752   :  { %v3680_v56 = vpop.eup %3679  ;;  %3683 = vtanh.f32 %v1450_v47 }
 0x753   :  { %v3682_v50 = vpop.eup %3681  ;;  %v1214_v57 = vmul.f32 0.5, %v3680_v56  ;;  %3685 = vtanh.f32 %v1451_v51  ;;  %v1563_v51 = vld [vmem:[#allocation2 + $0x8] sm:$0x3] }
 0x754   :  { %v1215_v22 = vmul.f32 %v3682_v50, %v4199_v54 }
 0x755   :  { %v1216_v58 = vadd.f32 0.5, %v1214_v57 }
 0x756   :  { %v1217_v61 = vadd.f32 %v1215_v22, %v4202_v62 }
 0x757   :  { %v1218_v28 = vmul.f32 %v1216_v58, %v4375_v63 }
 0x758   :  { %v1219_v3 = vmul.f32 %v1217_v61, %v1216_v58 }
 0x75a   :  { %1221 = vrot.lane.b32.xlu0 %v1219_v3, %s3971_s7 }
 0x75c   :  { %v3684_v5 = vpop.eup %3683 }
 0x75d   :  { %v3686_v11 = vpop.eup %3685  ;;  %v1454_v18 = vmul.f32 0.5, %v3684_v5 }
 0x75e   :  { %v1455_v19 = vmul.f32 %v3686_v11, %v4199_v54 }
 0x75f   :  { %v1456_v23 = vadd.f32 0.5, %v1454_v18 }
 0x760   :  { %v1457_v41 = vadd.f32 %v1455_v19, %v4202_v62 }
 0x761   :  { %v1458_v2 = vmul.f32 %v1456_v23, %v4379_v12 }
 0x762   :  { %v1459_v55 = vmul.f32 %v1457_v41, %v1456_v23 }
 0x764   :  { %1461 = vrot.lane.b32.xlu1 %v1459_v55, %s3971_s7 }
 0x7cc   :  { %v1222_v29 = vpop.permute.xlu0 %1221 }
 0x7cd   :  { %v4435_v1 = vadd.f32 %v1222_v29, %v1218_v28 }
 0x7cf   :  { %3687 = vtanh.f32 %v4435_v1 }
 0x7d6   :  { %v1462_v30 = vpop.permute.xlu1 %1461 }
 0x7d7   :  { %v4439_v31 = vadd.f32 %v1462_v30, %v1458_v2 }
 0x7d9   :  { %v3688_v36 = vpop.eup %3687  ;;  %3689 = vtanh.f32 %v4439_v31 }
 0x7da   :  { %v1226_v46 = vmul.f32 %v3688_v36, %v1217_v61 }
 0x7dc   :  { %1230 = vrot.lane.b32.xlu0 %v1226_v46, %s3971_s7 }
 0x7e3   :  { %v3690_v47 = vpop.eup %3689 }
 0x7e4   :  { %v1466_v49 = vmul.f32 %v3690_v47, %v1457_v41 }
 0x7e6   :  { %1468 = vrot.lane.b32.xlu1 %v1466_v49, %s3971_s7 }
 0x84e   :  { %v1231_v63 = vpop.permute.xlu0 %1230 }
 0x84f   :  { %3023 = vmatmul.mubr.msk.f32.vlgmr.msra.gmra.mrb[6].mxu0 %vm225_vm0, %v1231_v63 }
 0x850   :  { %3316 = vmatpush1.bf16.msra.mxu0 %v4239_v52  ;;  %1536 = vmatprep.mubr.f32.mxu0 %v3969_v0 }
 0x851   :  { %3318 = vmatprep.subr.bf16.mxu0 %v4242_v53 }
 0x854   :  { %3320 = vmatpush1.bf16.msra.mxu0 %v4246_v59 }
 0x855   :  { %3322 = vmatprep.subr.bf16.mxu0 %v4250_v60 }
 0x858   :  { %v1469_v12 = vpop.permute.xlu1 %1468  ;;  %3324 = vmatpush1.bf16.msra.mxu0 %v4253_v6 }
 0x859   :  { %3028 = vmatmul.mubr.msk.f32.vlgmr.msra.gmra.mrb[8].mxu1 %vm225_vm0, %v1469_v12  ;;  %3326 = vmatprep.subr.bf16.mxu0 %v4256_v7 }
 0x85a   :  { %3364 = vmatpush1.bf16.msra.mxu1 %v4163_v32  ;;  %1778 = vmatprep.mubr.f32.mxu1 %v3969_v0 }
 0x85b   :  { %3366 = vmatprep.subr.bf16.mxu1 %v4166_v33 }
 0x85c   :  { %3328 = vmatpush1.bf16.msra.mxu0 %v4259_v13 }
 0x85d   :  { %3330 = vmatprep.subr.bf16.mxu0 %v4213_v10 }
 0x85e   :  { %3368 = vmatpush1.bf16.msra.mxu1 %v4170_v38 }
 0x85f   :  { %3026 = vmatmul.mubr.msk.f32.vlgmr.msra.gmra.mrb[6].mxu0 %vm225_vm0, %v1469_v12  ;;  %3370 = vmatprep.subr.bf16.mxu1 %v4174_v39 }
 0x860   :  { %3332 = vmatpush1.bf16.msra.mxu0 %v4215_v16  ;;  %1633 = vmatprep.mubr.f32.mxu0 %v3969_v0 }
 0x861   :  { %3334 = vmatprep.subr.bf16.mxu0 %v4217_v17 }
 0x862   :  { %3372 = vmatpush1.bf16.msra.mxu1 %v4177_v44 }
 0x863   :  { %3374 = vmatprep.subr.bf16.mxu1 %v4180_v45 }
 0x864   :  { %3336 = vmatpush1.bf16.msra.mxu0 %v4221_v24 }
 0x865   :  { %3338 = vmatprep.subr.bf16.mxu0 %v4224_v25 }
 0x866   :  { %3376 = vmatpush1.bf16.msra.mxu1 %v4183_v48 }
 0x867   :  { %3410 = vmatprep.subr.bf16.mxu1 %v4137_v4 }
 0x868   :  { %3340 = vmatpush1.bf16.msra.mxu0 %v4227_v34 }
 0x869   :  { %3029 = vmatmul.mubr.msk.f32.vlgmr.msra.gmra.mrb[8].mxu1 %vm225_vm0, %v1563_v51  ;;  %3342 = vmatprep.subr.bf16.mxu0 %v4230_v35 }
 0x86a   :  { %3412 = vmatpush1.bf16.msra.mxu1 %v4139_v8  ;;  %2039 = vmatprep.mubr.f32.mxu1 %v3969_v0 }
 0x86b   :  { %3414 = vmatprep.subr.bf16.mxu1 %v4141_v9 }
 0x86c   :  { %3344 = vmatpush1.bf16.msra.mxu0 %v4233_v42 }
 0x86d   :  { %3378 = vmatprep.subr.bf16.mxu0 %v4236_v43 }
 0x86e   :  { %3416 = vmatpush1.bf16.msra.mxu1 %v4145_v14 }
 0x86f   :  { %3418 = vmatprep.subr.bf16.mxu1 %v4148_v15 }
 0x872   :  { %3420 = vmatpush1.bf16.msra.mxu1 %v4151_v20 }
 0x873   :  { %3422 = vmatprep.subr.bf16.mxu1 %v4154_v21 }
 0x876   :  { %3424 = vmatpush1.bf16.msra.mxu1 %v4157_v26 }
 0x877   :  { %3426 = vmatprep.subr.bf16.mxu1 %v4160_v27 }
 0x932   :  { %v1538_v56 = vpop.f32.mrb[6].mxu0 }
 0x933   :  { %v1543_v50 = vadd.f32 %v1538_v56, %v4301_v37  ;;  %v1540_v57 = vpop.f32.mrb[7].mxu0 }
 0x934   :  { %v1544_v22 = vadd.f32 %v1540_v57, %v4303_v40 }
 0x935   :  { %v1545_v58 = vmul.f32 0.5, %v1543_v50 }
 0x936   :  { %v1546_v61 = vmul.f32 %v1544_v22, %v4199_v54 }
 0x937   :  { %3691 = vtanh.f32 %v1545_v58 }
 0x938   :  { %3693 = vtanh.f32 %v1546_v61 }
 0x93c   :  { %v1780_v3 = vpop.f32.mrb[8].mxu1 }
 0x93d   :  { %v1785_v5 = vmul.f32 0.5, %v1780_v3  ;;  %v1782_v11 = vpop.f32.mrb[9].mxu1 }
 0x93e   :  { %v1786_v18 = vmul.f32 %v1782_v11, %v4199_v54 }
 0x93f   :  { %3695 = vtanh.f32 %v1785_v5 }
 0x940   :  { %3697 = vtanh.f32 %v1786_v18  ;;  %v1898_v18 = vld [vmem:[#allocation2 + $0xa] sm:$0x3] }
 0x941   :  { %v3692_v19 = vpop.eup %3691 }
 0x942   :  { %v3694_v23 = vpop.eup %3693  ;;  %v1549_v41 = vmul.f32 0.5, %v3692_v19 }
 0x943   :  { %v1550_v55 = vmul.f32 %v3694_v23, %v4199_v54 }
 0x944   :  { %v1551_v28 = vadd.f32 0.5, %v1549_v41 }
 0x945   :  { %v1552_v29 = vadd.f32 %v1550_v55, %v4202_v62 }
 0x946   :  { %v1553_v51 = vmul.f32 %v1551_v28, %v4435_v1 }
 0x947   :  { %v1554_v2 = vmul.f32 %v1552_v29, %v1551_v28 }
 0x949   :  { %v3696_v30 = vpop.eup %3695  ;;  %1556 = vrot.lane.b32.xlu0 %v1554_v2, %s3971_s7 }
 0x94a   :  { %v3698_v36 = vpop.eup %3697  ;;  %v1789_v46 = vmul.f32 0.5, %v3696_v30 }
 0x94b   :  { %v1790_v47 = vmul.f32 %v3698_v36, %v4199_v54 }
 0x94c   :  { %v1791_v49 = vadd.f32 0.5, %v1789_v46 }
 0x94d   :  { %v1792_v63 = vadd.f32 %v1790_v47, %v4202_v62 }
 0x94e   :  { %v1793_v57 = vmul.f32 %v1791_v49, %v4439_v31 }
 0x94f   :  { %v1794_v12 = vmul.f32 %v1792_v63, %v1791_v49 }
 0x951   :  { %1796 = vrot.lane.b32.xlu1 %v1794_v12, %s3971_s7 }
 0x9bb   :  { %v1557_v56 = vpop.permute.xlu0 %1556 }
 0x9bc   :  { %v4495_v50 = vadd.f32 %v1557_v56, %v1553_v51 }
 0x9be   :  { %3699 = vtanh.f32 %v4495_v50 }
 0x9c3   :  { %v1797_v22 = vpop.permute.xlu1 %1796 }
 0x9c4   :  { %v4499_v58 = vadd.f32 %v1797_v22, %v1793_v57 }
 0x9c6   :  { %3701 = vtanh.f32 %v4499_v58 }
 0x9c8   :  { %v3700_v61 = vpop.eup %3699 }
 0x9c9   :  { %v1561_v3 = vmul.f32 %v3700_v61, %v1552_v29 }
 0x9cb   :  { %1565 = vrot.lane.b32.xlu0 %v1561_v3, %s3971_s7 }
 0x9d0   :  { %v3702_v5 = vpop.eup %3701 }
 0x9d1   :  { %v1801_v11 = vmul.f32 %v3702_v5, %v1792_v63 }
 0x9d3   :  { %1803 = vrot.lane.b32.xlu1 %v1801_v11, %s3971_s7 }
 0xa3d   :  { %v1566_v1 = vpop.permute.xlu0 %1565 }
 0xa3e   :  { %3027 = vmatmul.mubr.msk.f32.vlgmr.msra.gmra.mrb[8].mxu0 %vm225_vm0, %v1566_v1 }
 0xa3f   :  { %3380 = vmatpush1.bf16.msra.mxu0 %v4239_v52  ;;  %1871 = vmatprep.mubr.f32.mxu0 %v3969_v0 }
 0xa40   :  { %3382 = vmatprep.subr.bf16.mxu0 %v4242_v53 }
 0xa43   :  { %3384 = vmatpush1.bf16.msra.mxu0 %v4246_v59 }
 0xa44   :  { %3386 = vmatprep.subr.bf16.mxu0 %v4250_v60 }
 0xa45   :  { %v1804_v31 = vpop.permute.xlu1 %1803 }
 0xa46   :  { %3032 = vmatmul.mubr.msk.f32.vlgmr.msra.gmra.mrb[10].mxu1 %vm225_vm0, %v1804_v31 }
 0xa47   :  { %3428 = vmatpush1.bf16.msra.mxu1 %v4163_v32  ;;  %3388 = vmatpush1.bf16.msra.mxu0 %v4253_v6 }
 0xa48   :  { %3430 = vmatprep.subr.bf16.mxu1 %v4166_v33  ;;  %3390 = vmatprep.subr.bf16.mxu0 %v4256_v7 }
 0xa49   :  { %2113 = vmatprep.mubr.f32.mxu1 %v3969_v0 }
 0xa4b   :  { %3432 = vmatpush1.bf16.msra.mxu1 %v4170_v38  ;;  %3392 = vmatpush1.bf16.msra.mxu0 %v4259_v13 }
 0xa4c   :  { %3434 = vmatprep.subr.bf16.mxu1 %v4174_v39  ;;  %3394 = vmatprep.subr.bf16.mxu0 %v4213_v10 }
 0xa4e   :  { %3030 = vmatmul.mubr.msk.f32.vlgmr.msra.gmra.mrb[8].mxu0 %vm225_vm0, %v1804_v31 }
 0xa4f   :  { %3436 = vmatpush1.bf16.msra.mxu1 %v4177_v44  ;;  %3396 = vmatpush1.bf16.msra.mxu0 %v4215_v16 }
 0xa50   :  { %3438 = vmatprep.subr.bf16.mxu1 %v4180_v45  ;;  %3398 = vmatprep.subr.bf16.mxu0 %v4217_v17 }
 0xa51   :  { %1968 = vmatprep.mubr.f32.mxu0 %v3969_v0 }
 0xa53   :  { %3440 = vmatpush1.bf16.msra.mxu1 %v4183_v48  ;;  %3400 = vmatpush1.bf16.msra.mxu0 %v4221_v24 }
 0xa54   :  { %3474 = vmatprep.subr.bf16.mxu1 %v4137_v4  ;;  %3402 = vmatprep.subr.bf16.mxu0 %v4224_v25 }
 0xa56   :  { %3033 = vmatmul.mubr.msk.f32.vlgmr.msra.gmra.mrb[10].mxu1 %vm225_vm0, %v1898_v18 }
 0xa57   :  { %3476 = vmatpush1.bf16.msra.mxu1 %v4139_v8  ;;  %3404 = vmatpush1.bf16.msra.mxu0 %v4227_v34 }
 0xa58   :  { %3478 = vmatprep.subr.bf16.mxu1 %v4141_v9  ;;  %3406 = vmatprep.subr.bf16.mxu0 %v4230_v35 }
 0xa59   :  { %2374 = vmatprep.mubr.f32.mxu1 %v3969_v0 }
 0xa5b   :  { %3480 = vmatpush1.bf16.msra.mxu1 %v4145_v14  ;;  %3408 = vmatpush1.bf16.msra.mxu0 %v4233_v42 }
 0xa5c   :  { %3482 = vmatprep.subr.bf16.mxu1 %v4148_v15  ;;  %3442 = vmatprep.subr.bf16.mxu0 %v4236_v43 }
 0xa5f   :  { %3484 = vmatpush1.bf16.msra.mxu1 %v4151_v20 }
 0xa60   :  { %3486 = vmatprep.subr.bf16.mxu1 %v4154_v21 }
 0xa63   :  { %3488 = vmatpush1.bf16.msra.mxu1 %v4157_v26 }
 0xa64   :  { %3490 = vmatprep.subr.bf16.mxu1 %v4160_v27 }
 0xb21   :  { %v1873_v19 = vpop.f32.mrb[8].mxu0 }
 0xb22   :  { %v1878_v23 = vadd.f32 %v1873_v19, %v4301_v37  ;;  %v1875_v41 = vpop.f32.mrb[9].mxu0 }
 0xb23   :  { %v1879_v55 = vadd.f32 %v1875_v41, %v4303_v40 }
 0xb24   :  { %v1880_v28 = vmul.f32 0.5, %v1878_v23 }
 0xb25   :  { %v1881_v29 = vmul.f32 %v1879_v55, %v4199_v54 }
 0xb26   :  { %3703 = vtanh.f32 %v1880_v28 }
 0xb27   :  { %3705 = vtanh.f32 %v1881_v29 }
 0xb29   :  { %v2115_v2 = vpop.f32.mrb[10].mxu1 }
 0xb2a   :  { %v2120_v30 = vmul.f32 0.5, %v2115_v2  ;;  %v2117_v36 = vpop.f32.mrb[11].mxu1 }
 0xb2b   :  { %v2121_v46 = vmul.f32 %v2117_v36, %v4199_v54 }
 0xb2c   :  { %3707 = vtanh.f32 %v2120_v30 }
 0xb2d   :  { %3709 = vtanh.f32 %v2121_v46  ;;  %v2233_v46 = vld [vmem:[#allocation2 + $0xc] sm:$0x3] }
 0xb30   :  { %v3704_v47 = vpop.eup %3703 }
 0xb31   :  { %v3706_v49 = vpop.eup %3705  ;;  %v1884_v63 = vmul.f32 0.5, %v3704_v47 }
 0xb32   :  { %v1885_v12 = vmul.f32 %v3706_v49, %v4199_v54 }
 0xb33   :  { %v1886_v51 = vadd.f32 0.5, %v1884_v63 }
 0xb34   :  { %v1887_v56 = vadd.f32 %v1885_v12, %v4202_v62 }
 0xb35   :  { %v1888_v18 = vmul.f32 %v1886_v51, %v4495_v50 }
 0xb36   :  { %v3708_v57 = vpop.eup %3707  ;;  %v1889_v22 = vmul.f32 %v1887_v56, %v1886_v51 }
 0xb37   :  { %v3710_v61 = vpop.eup %3709  ;;  %v2124_v3 = vmul.f32 0.5, %v3708_v57 }
 0xb38   :  { %1891 = vrot.lane.b32.xlu0 %v1889_v22, %s3971_s7  ;;  %v2125_v5 = vmul.f32 %v3710_v61, %v4199_v54 }
 0xb39   :  { %v2126_v11 = vadd.f32 0.5, %v2124_v3 }
 0xb3a   :  { %v2127_v1 = vadd.f32 %v2125_v5, %v4202_v62 }
 0xb3b   :  { %v2128_v41 = vmul.f32 %v2126_v11, %v4499_v58 }
 0xb3c   :  { %v2129_v31 = vmul.f32 %v2127_v1, %v2126_v11 }
 0xb3e   :  { %2131 = vrot.lane.b32.xlu1 %v2129_v31, %s3971_s7 }
 0xbaa   :  { %v1892_v19 = vpop.permute.xlu0 %1891 }
 0xbab   :  { %v4555_v23 = vadd.f32 %v1892_v19, %v1888_v18 }
 0xbad   :  { %3711 = vtanh.f32 %v4555_v23 }
 0xbb0   :  { %v2132_v55 = vpop.permute.xlu1 %2131 }
 0xbb1   :  { %v4559_v28 = vadd.f32 %v2132_v55, %v2128_v41 }
 0xbb3   :  { %3713 = vtanh.f32 %v4559_v28 }
 0xbb7   :  { %v3712_v29 = vpop.eup %3711 }
 0xbb8   :  { %v1896_v2 = vmul.f32 %v3712_v29, %v1887_v56 }
 0xbba   :  { %1900 = vrot.lane.b32.xlu0 %v1896_v2, %s3971_s7 }
 0xbbd   :  { %v3714_v30 = vpop.eup %3713 }
 0xbbe   :  { %v2136_v36 = vmul.f32 %v3714_v30, %v2127_v1 }
 0xbc0   :  { %2138 = vrot.lane.b32.xlu1 %v2136_v36, %s3971_s7 }
 0xc2c   :  { %v1901_v50 = vpop.permute.xlu0 %1900 }
 0xc2d   :  { %3031 = vmatmul.mubr.msk.f32.vlgmr.msra.gmra.mrb[10].mxu0 %vm225_vm0, %v1901_v50 }
 0xc2e   :  { %3444 = vmatpush1.bf16.msra.mxu0 %v4239_v52  ;;  %2206 = vmatprep.mubr.f32.mxu0 %v3969_v0 }
 0xc2f   :  { %3446 = vmatprep.subr.bf16.mxu0 %v4242_v53 }
 0xc32   :  { %v2139_v58 = vpop.permute.xlu1 %2138  ;;  %3448 = vmatpush1.bf16.msra.mxu0 %v4246_v59 }
 0xc33   :  { %3036 = vmatmul.mubr.msk.f32.vlgmr.msra.gmra.mrb[12].mxu1 %vm225_vm0, %v2139_v58  ;;  %3450 = vmatprep.subr.bf16.mxu0 %v4250_v60 }
 0xc34   :  { %3492 = vmatpush1.bf16.msra.mxu1 %v4163_v32  ;;  %2448 = vmatprep.mubr.f32.mxu1 %v3969_v0 }
 0xc35   :  { %3494 = vmatprep.subr.bf16.mxu1 %v4166_v33 }
 0xc36   :  { %3452 = vmatpush1.bf16.msra.mxu0 %v4253_v6 }
 0xc37   :  { %3454 = vmatprep.subr.bf16.mxu0 %v4256_v7 }
 0xc38   :  { %3496 = vmatpush1.bf16.msra.mxu1 %v4170_v38 }
 0xc39   :  { %3498 = vmatprep.subr.bf16.mxu1 %v4174_v39 }
 0xc3a   :  { %3456 = vmatpush1.bf16.msra.mxu0 %v4259_v13 }
 0xc3b   :  { %3458 = vmatprep.subr.bf16.mxu0 %v4213_v10 }
 0xc3c   :  { %3500 = vmatpush1.bf16.msra.mxu1 %v4177_v44 }
 0xc3d   :  { %3034 = vmatmul.mubr.msk.f32.vlgmr.msra.gmra.mrb[10].mxu0 %vm225_vm0, %v2139_v58  ;;  %3502 = vmatprep.subr.bf16.mxu1 %v4180_v45 }
 0xc3e   :  { %3460 = vmatpush1.bf16.msra.mxu0 %v4215_v16  ;;  %2303 = vmatprep.mubr.f32.mxu0 %v3969_v0 }
 0xc3f   :  { %3462 = vmatprep.subr.bf16.mxu0 %v4217_v17 }
 0xc40   :  { %3504 = vmatpush1.bf16.msra.mxu1 %v4183_v48 }
 0xc41   :  { %3538 = vmatprep.subr.bf16.mxu1 %v4137_v4 }
 0xc42   :  { %3464 = vmatpush1.bf16.msra.mxu0 %v4221_v24 }
 0xc43   :  { %3037 = vmatmul.mubr.msk.f32.vlgmr.msra.gmra.mrb[12].mxu1 %vm225_vm0, %v2233_v46  ;;  %3466 = vmatprep.subr.bf16.mxu0 %v4224_v25 }
 0xc44   :  { %3540 = vmatpush1.bf16.msra.mxu1 %v4139_v8  ;;  %2709 = vmatprep.mubr.f32.mxu1 %v3969_v0 }
 0xc45   :  { %3542 = vmatprep.subr.bf16.mxu1 %v4141_v9 }
 0xc46   :  { %3468 = vmatpush1.bf16.msra.mxu0 %v4227_v34 }
 0xc47   :  { %3470 = vmatprep.subr.bf16.mxu0 %v4230_v35 }
 0xc48   :  { %3544 = vmatpush1.bf16.msra.mxu1 %v4145_v14 }
 0xc49   :  { %3546 = vmatprep.subr.bf16.mxu1 %v4148_v15 }
 0xc4a   :  { %3472 = vmatpush1.bf16.msra.mxu0 %v4233_v42 }
 0xc4b   :  { %3506 = vmatprep.subr.bf16.mxu0 %v4236_v43 }
 0xc4c   :  { %3548 = vmatpush1.bf16.msra.mxu1 %v4151_v20 }
 0xc4d   :  { %3550 = vmatprep.subr.bf16.mxu1 %v4154_v21 }
 0xc50   :  { %3552 = vmatpush1.bf16.msra.mxu1 %v4157_v26 }
 0xc51   :  { %3554 = vmatprep.subr.bf16.mxu1 %v4160_v27 }
 0xd10   :  { %v2208_v4 = vpop.f32.mrb[10].mxu0 }
 0xd11   :  { %v2213_v8 = vadd.f32 %v2208_v4, %v4301_v37  ;;  %v2210_v9 = vpop.f32.mrb[11].mxu0 }
 0xd12   :  { %v2214_v14 = vadd.f32 %v2210_v9, %v4303_v40 }
 0xd13   :  { %v2215_v47 = vmul.f32 0.5, %v2213_v8 }
 0xd14   :  { %v2216_v15 = vmul.f32 %v2214_v14, %v4199_v54 }
 0xd15   :  { %3715 = vtanh.f32 %v2215_v47 }
 0xd16   :  { %3717 = vtanh.f32 %v2216_v15  ;;  %v2450_v49 = vpop.f32.mrb[12].mxu1 }
 0xd17   :  { %v2455_v63 = vmul.f32 0.5, %v2450_v49  ;;  %v2452_v20 = vpop.f32.mrb[13].mxu1 }
 0xd18   :  { %v2456_v21 = vmul.f32 %v2452_v20, %v4199_v54 }
 0xd19   :  { %3719 = vtanh.f32 %v2455_v63 }
 0xd1a   :  { %3721 = vtanh.f32 %v2456_v21 }
 0xd1f   :  { %v3716_v26 = vpop.eup %3715 }
 0xd20   :  { %v3718_v27 = vpop.eup %3717  ;;  %v2219_v12 = vmul.f32 0.5, %v3716_v26 }
 0xd21   :  { %v2220_v51 = vmul.f32 %v3718_v27, %v4199_v54 }
 0xd22   :  { %v2221_v56 = vadd.f32 0.5, %v2219_v12 }
 0xd23   :  { %v3720_v57 = vpop.eup %3719  ;;  %v2222_v22 = vadd.f32 %v2220_v51, %v4202_v62 }
 0xd24   :  { %v3722_v61 = vpop.eup %3721  ;;  %v2459_v3 = vmul.f32 0.5, %v3720_v57  ;;  %v2223_v19 = vmul.f32 %v2221_v56, %v4555_v23 }
 0xd25   :  { %v2224_v5 = vmul.f32 %v2222_v22, %v2221_v56  ;;  %v2460_v11 = vmul.f32 %v3722_v61, %v4199_v54 }
 0xd26   :  { %v2461_v1 = vadd.f32 0.5, %v2459_v3 }
 0xd27   :  { %2226 = vrot.lane.b32.xlu0 %v2224_v5, %s3971_s7  ;;  %v2462_v31 = vadd.f32 %v2460_v11, %v4202_v62 }
 0xd28   :  { %v2463_v29 = vmul.f32 %v2461_v1, %v4559_v28 }
 0xd29   :  { %v2464_v18 = vmul.f32 %v2462_v31, %v2461_v1 }
 0xd2b   :  { %2466 = vrot.lane.b32.xlu1 %v2464_v18, %s3971_s7 }
 0xd99   :  { %v2227_v41 = vpop.permute.xlu0 %2226 }
 0xd9a   :  { %v4615_v55 = vadd.f32 %v2227_v41, %v2223_v19 }
 0xd9c   :  { %3723 = vtanh.f32 %v4615_v55 }
 0xd9d   :  { %v2467_v2 = vpop.permute.xlu1 %2466 }
 0xd9e   :  { %v4619_v30 = vadd.f32 %v2467_v2, %v2463_v29  ;;  %v2903_v29 = vld [vmem:[#allocation13 + $0x8] sm:$0xff]  ;;  %v2904_v2 = vld [vmem:[#allocation13 + $0x10] sm:$0xff] }
 0xda0   :  { %3725 = vtanh.f32 %v4619_v30 }
 0xda6   :  { %v3724_v36 = vpop.eup %3723 }
 0xda7   :  { %v2231_v50 = vmul.f32 %v3724_v36, %v2222_v22  ;;  %v2905_v36 = vld [vmem:[#allocation13 + $0x18] sm:$0xff] }
 0xda9   :  { %2235 = vrot.lane.b32.xlu0 %v2231_v50, %s3971_s7  ;;  %v3589_v50 = vpack.c.bf16 %v2905_v36, %v2904_v2 }
 0xdaa   :  { %v3726_v58 = vpop.eup %3725 }
 0xdab   :  { %v2471_v46 = vmul.f32 %v3726_v58, %v2462_v31  ;;  %v2907_v58 = vld [vmem:[#allocation13 + $0x28] sm:$0xff] }
 0xdad   :  { %2473 = vrot.lane.b32.xlu1 %v2471_v46, %s3971_s7  ;;  %v2908_v46 = vld [vmem:[#allocation13 + $0x30] sm:$0xff] }
 0xe1b   :  { %v2236_v23 = vpop.permute.xlu0 %2235 }
 0xe1c   :  { %3035 = vmatmul.mubr.msk.f32.vlgmr.msra.gmra.mrb[12].mxu0 %vm225_vm0, %v2236_v23  ;;  %v2909_v23 = vld [vmem:[#allocation13 + $0x38] sm:$0xff] }
 0xe1d   :  { %3508 = vmatpush1.bf16.msra.mxu0 %v4239_v52  ;;  %2541 = vmatprep.mubr.f32.mxu0 %v3969_v0 }
 0xe1e   :  { %3510 = vmatprep.subr.bf16.mxu0 %v4242_v53 }
 0xe1f   :  { %v2474_v28 = vpop.permute.xlu1 %2473 }
 0xe20   :  { %3040 = vmatmul.mubr.msk.f32.vlgmr.msra.gmra.mrb[14].mxu1 %vm225_vm0, %v2474_v28 }
 0xe21   :  { %3556 = vmatpush1.bf16.msra.mxu1 %v4163_v32  ;;  %3512 = vmatpush1.bf16.msra.mxu0 %v4246_v59  ;;  %v2568_v32 = vld [vmem:[#allocation2 + $0xe] sm:$0x3] }
 0xe22   :  { %3558 = vmatprep.subr.bf16.mxu1 %v4166_v33  ;;  %3514 = vmatprep.subr.bf16.mxu0 %v4250_v60 }
 0xe23   :  { %2783 = vmatprep.mubr.f32.mxu1 %v3969_v0 }
 0xe25   :  { %3560 = vmatpush1.bf16.msra.mxu1 %v4170_v38  ;;  %3516 = vmatpush1.bf16.msra.mxu0 %v4253_v6 }
 0xe26   :  { %3562 = vmatprep.subr.bf16.mxu1 %v4174_v39  ;;  %3518 = vmatprep.subr.bf16.mxu0 %v4256_v7 }
 0xe29   :  { %3564 = vmatpush1.bf16.msra.mxu1 %v4177_v44  ;;  %3520 = vmatpush1.bf16.msra.mxu0 %v4259_v13 }
 0xe2a   :  { %3566 = vmatprep.subr.bf16.mxu1 %v4180_v45  ;;  %3522 = vmatprep.subr.bf16.mxu0 %v4213_v10 }
 0xe2c   :  { %3038 = vmatmul.mubr.msk.f32.vlgmr.msra.gmra.mrb[12].mxu0 %vm225_vm0, %v2474_v28  ;;  %v3595_v28 = vpack.c.bf16 %v2909_v23, %v2908_v46 }
 0xe2d   :  { %3568 = vmatpush1.bf16.msra.mxu1 %v4183_v48  ;;  %3524 = vmatpush1.bf16.msra.mxu0 %v4215_v16 }
 0xe2e   :  { %3526 = vmatprep.subr.bf16.mxu0 %v4217_v17  ;;  %2638 = vmatprep.mubr.f32.mxu0 %v3969_v0 }
 0xe30   :  { %3041 = vmatmul.mubr.msk.f32.vlgmr.msra.gmra.mrb[14].mxu1 %vm225_vm0, %v2568_v32 }
 0xe31   :  { %3528 = vmatpush1.bf16.msra.mxu0 %v4221_v24 }
 0xe32   :  { %3530 = vmatprep.subr.bf16.mxu0 %v4224_v25 }
 0xe35   :  { %3532 = vmatpush1.bf16.msra.mxu0 %v4227_v34 }
 0xe36   :  { %3534 = vmatprep.subr.bf16.mxu0 %v4230_v35 }
 0xe39   :  { %3536 = vmatpush1.bf16.msra.mxu0 %v4233_v42 }
 0xe3a   :  { %3570 = vmatprep.subr.bf16.mxu0 %v4236_v43 }
 0xeff   :  { %v2543_v33 = vpop.f32.mrb[12].mxu0 }
 0xf00   :  { %v2548_v38 = vadd.f32 %v2543_v33, %v4301_v37  ;;  %v2545_v39 = vpop.f32.mrb[13].mxu0 }
 0xf01   :  { %v2549_v44 = vadd.f32 %v2545_v39, %v4303_v40 }
 0xf02   :  { %v2550_v45 = vmul.f32 0.5, %v2548_v38 }
 0xf03   :  { %v2551_v48 = vmul.f32 %v2549_v44, %v4199_v54  ;;  %v2785_v10 = vpop.f32.mrb[14].mxu1 }
 0xf04   :  { %3727 = vtanh.f32 %v2550_v45  ;;  %v2790_v16 = vmul.f32 0.5, %v2785_v10  ;;  %v2787_v17 = vpop.f32.mrb[15].mxu1  ;;  %v3043_v45 = vld [vmem:[#allocation14] ss:$0 sm:$0xff] }
 0xf05   :  { %3729 = vtanh.f32 %v2551_v48  ;;  %v2791_v24 = vmul.f32 %v2787_v17, %v4199_v54 }
 0xf06   :  { %3731 = vtanh.f32 %v2790_v16 }
 0xf07   :  { %3733 = vtanh.f32 %v2791_v24 }
 0xf0e   :  { %v3728_v25 = vpop.eup %3727 }
 0xf0f   :  { %v3730_v34 = vpop.eup %3729  ;;  %v2554_v35 = vmul.f32 0.5, %v3728_v25 }
 0xf10   :  { %v3732_v42 = vpop.eup %3731  ;;  %v2555_v43 = vmul.f32 %v3730_v34, %v4199_v54 }
 0xf11   :  { %v3734_v4 = vpop.eup %3733  ;;  %v2556_v8 = vadd.f32 0.5, %v2554_v35  ;;  %v2794_v9 = vmul.f32 0.5, %v3732_v42 }
 0xf12   :  { %v2557_v14 = vadd.f32 %v2555_v43, %v4202_v62  ;;  %v2795_v47 = vmul.f32 %v3734_v4, %v4199_v54 }
 0xf13   :  { %v2796_v15 = vadd.f32 0.5, %v2794_v9  ;;  %v2558_v21 = vmul.f32 %v2556_v8, %v4615_v55 }
 0xf14   :  { %v2559_v49 = vmul.f32 %v2557_v14, %v2556_v8  ;;  %v2797_v63 = vadd.f32 %v2795_v47, %v4202_v62 }
 0xf15   :  { %v2798_v12 = vmul.f32 %v2796_v15, %v4619_v30 }
 0xf16   :  { %2561 = vrot.lane.b32.xlu0 %v2559_v49, %s3971_s7  ;;  %v2799_v20 = vmul.f32 %v2797_v63, %v2796_v15 }
 0xf18   :  { %2801 = vrot.lane.b32.xlu1 %v2799_v20, %s3971_s7 }
 0xf88   :  { %v2562_v26 = vpop.permute.xlu0 %2561 }
 0xf89   :  { %v4665_v27 = vadd.f32 %v2562_v26, %v2558_v21 }
 0xf8a   :  { %v2802_v51 = vpop.permute.xlu1 %2801 }
 0xf8b   :  { %3735 = vtanh.f32 %v4665_v27  ;;  %v2804_v56 = vadd.f32 %v2802_v51, %v2798_v12 }
 0xf8d   :  { %3737 = vtanh.f32 %v2804_v56 }
 0xf95   :  { %v3736_v57 = vpop.eup %3735 }
 0xf96   :  { %v2566_v22 = vmul.f32 %v3736_v57, %v2557_v14 }
 0xf97   :  { %v3738_v61 = vpop.eup %3737 }
 0xf98   :  { %2570 = vrot.lane.b32.xlu0 %v2566_v22, %s3971_s7  ;;  %v2806_v3 = vmul.f32 %v3738_v61, %v2797_v63 }
 0xf9a   :  { %2808 = vrot.lane.b32.xlu1 %v2806_v3, %s3971_s7 }
0x100a   :  { %v2571_v5 = vpop.permute.xlu0 %2570 }
0x100b   :  { %3039 = vmatmul.mubr.msk.f32.vlgmr.msra.gmra.mrb[14].mxu0 %vm225_vm0, %v2571_v5 }
0x100c   :  { %3572 = vmatpush1.bf16.msra.mxu0 %v4239_v52  ;;  %2876 = vmatprep.mubr.f32.mxu0 %v3969_v0  ;;  %v2809_v11 = vpop.permute.xlu1 %2808 }
0x100d   :  { %3574 = vmatprep.subr.bf16.mxu0 %v4242_v53 }
0x1010   :  { %3576 = vmatpush1.bf16.msra.mxu0 %v4246_v59 }
0x1011   :  { %3578 = vmatprep.subr.bf16.mxu0 %v4250_v60 }
0x1014   :  { %3580 = vmatpush1.bf16.msra.mxu0 %v4253_v6 }
0x1015   :  { %3582 = vmatprep.subr.bf16.mxu0 %v4256_v7 }
0x1018   :  { %3584 = vmatpush1.bf16.msra.mxu0 %v4259_v13 }
0x101b   :  { %3042 = vmatmul.mubr.msk.f32.vlgmr.msra.gmra.mrb[14].mxu0 %vm225_vm0, %v2809_v11 }
0x101c   :  { %3070 = vmatprep.mubr.msk.f32.mxu0 %vm3973_vm2, %v3969_v0 }
0x10ee   :  { %v2878_v1 = vpop.f32.mrb[14].mxu0 }
0x10ef   :  { %v2883_v52 = vadd.f32 %v2878_v1, %v4301_v37  ;;  %v2880_v31 = vpop.f32.mrb[15].mxu0  ;;  %v2902_v37 = vld [vmem:[#allocation13] sm:$0xff] }
0x10f0   :  { %v2884_v18 = vadd.f32 %v2880_v31, %v4303_v40  ;;  %v3972_v40 = vmov 0.0|0.0   ;;  %v3586_v30 = vpack.c.bf16 %v2903_v29, %v2902_v37 }
0x10f1   :  { %v2885_v53 = vmul.f32 0.5, %v2883_v52  ;;  %3585 = vmatprep.subr.bf16.mxu0 %v3972_v40 }
0x10f2   :  { %v2886_v59 = vmul.f32 %v2884_v18, %v4199_v54  ;;  %3587 = vmatpush3.bf16.msra.mxu0 %v3586_v30 }
0x10f3   :  { %3739 = vtanh.f32 %v2885_v53  ;;  %3588 = vmatprep.subr.bf16.mxu0 %v3972_v40 }
0x10f4   :  { %3741 = vtanh.f32 %v2886_v59 }
0x10f6   :  { %3590 = vmatpush3.bf16.msra.mxu0 %v3589_v50 }
0x10f7   :  { %3591 = vmatprep.subr.bf16.mxu0 %v3972_v40 }
0x10fd   :  { %v3740_v60 = vpop.eup %3739 }
0x10fe   :  { %v3742_v6 = vpop.eup %3741  ;;  %v2889_v19 = vmul.f32 0.5, %v3740_v60 }
0x10ff   :  { %v2890_v7 = vmul.f32 %v3742_v6, %v4199_v54  ;;  %v2906_v54 = vld [vmem:[#allocation13 + $0x20] sm:$0xff] }
0x1100   :  { %v2891_v13 = vadd.f32 0.5, %v2889_v19 }
0x1101   :  { %v2892_v41 = vadd.f32 %v2890_v7, %v4202_v62  ;;  %v3592_v62 = vpack.c.bf16 %v2907_v58, %v2906_v54 }
0x1102   :  { %v2893_v32 = vmul.f32 %v2891_v13, %v4665_v27 }
0x1103   :  { %v2894_v55 = vmul.f32 %v2892_v41, %v2891_v13  ;;  %3593 = vmatpush3.bf16.msra.mxu0 %v3592_v62 }
0x1104   :  { %3594 = vmatprep.subr.bf16.mxu0 %v3972_v40 }
0x1105   :  { %2896 = vrot.lane.b32.xlu0 %v2894_v55, %s3971_s7 }
0x1107   :  { %3596 = vmatpush3.bf16.msra.mxu0 %v3595_v28 }
0x1177   :  { %v2897_v33 = vpop.permute.xlu0 %2896 }
0x1178   :  { %v2899_v38 = vadd.f32 %v2897_v33, %v2893_v32 }
0x117a   :  { %3743 = vtanh.f32 %v2899_v38 }
0x1184   :  { %v3744_v0 = vpop.eup %3743 }
0x1185   :  { %v2901_v39 = vmul.f32 %v3744_v0, %v2892_v41 }
0x1187   :  { %2918 = vrot.lane.b32.xlu1 %v2901_v39, %s3971_s7 }
0x11f9   :  { %v2919_v44 = vpop.permute.xlu1 %2918 }
0x11fa   :  { %3071 = vmatmul.mubr.msk.f32.vlgmr.msra.gmra.mrb[16].mxu0 %vm225_vm0, %v2919_v44 }
0x12cd   :  { %v2988_v48 = vpop.f32.mrb[16].mxu0 }
0x12ce   :  { %v2989_v10 = vadd.f32 %v3043_v45, %v2988_v48  ;;  %v3072_v16 = vpop.f32.mrb[17].mxu0 }
0x12d0   :  { %2993 = vst.msk [vmem:[#allocation16] sm:$0x3] %vm2992_vm3, %v2989_v10 }
0x12d1   :  { %3932 = shalt.err (!%p3929_p12)
}
0x12d2   :  { %s3933_s13 = scalar_lea.hbm %s4711_s8, 32 }
0x12d3   :  { %p3934_p13 = scmp.ne.s32.totalorder %s4711_s8, %s3933_s13  ;;  %p3937_p0 = scmp.lt.u32.totalorder %s3933_s13, %s4711_s8 }
0x12d5   :  { %p3939_p1 = pnand %p3937_p0, %p3934_p13 }
0x12d7   :  { %3942 = shalt.err (!%p3939_p1)
}
0x12d8   :  { %3003 = dma.vmem_to_hbm [thread:$0]  %s3001_s9, 32, %s4711_s8, [#allocation4]  }
0x12d9   :  { %3953 = dma.done.wait [#allocation4], 32  }
0x12da   :  { %3954 = vsyncadd [#allocation4], 4294967264 }
0x12db   :  { %3007 = vsyncpa [#allocation3], 1 }
0x12dc   :  { %3008 = vsyncpa [#allocation6], 1 }
0x12dd   :  { %3009 = vsyncpa [#allocation9], 1 }
0x12de   :  { %3010 = vsyncpa [#allocation12], 1 }
0x12df   :  { %3011 = vsyncpa [#allocation15], 1 }
0x12e0   :  { %3012 = vsyncpa [#allocation4], 1 }

</bundles_post_ra>
